<compile_context>
chip_gen: v7x
topology: tpu7x:2x2x1
jax: 0.10.0
libtpu: 0.0.40
codegen_flags: <defaults>
</compile_context>

<pallas_src>
import functools

import jax
import jax.numpy as jnp
from jax.experimental import pallas as pl
from jax.experimental.pallas import tpu as pltpu


def _layernorm(x, g, b, eps=1e-12):
    mu = jnp.mean(x, axis=-1, keepdims=True)
    var = jnp.mean((x - mu) ** 2, axis=-1, keepdims=True)
    return (x - mu) * jax.lax.rsqrt(var + eps) * g + b


def make_text_encoder_kernel(C, B, L, H, F, E_pad, flat_scores, f_tile):
    """Fused single-layer BERT-style encoder + CLS projection for C chunks."""
    M = C * B * L
    CB = C * B

    def kernel(emb_ref, bias_ref, wqkv_ref, wo_ref, w1_ref, w2_ref, wl_ref,
               vech_ref, vecw_ref, out_ref):
        x_bf = emb_ref[...].reshape(M, H)            # bf16 MXU operand, batch in M
        x = x_bf.astype(jnp.float32)                 # f32 residual stream
        # TODO(synk): keep the residual in bf16 on v6e/v7x (bf16 VPU) and only
        # upcast inside _layernorm; v5e has no bf16 VPU so f32 is kept here.

        bo = vech_ref[0]
        ln1g = vech_ref[1]
        ln1b = vech_ref[2]
        b2 = vech_ref[3]
        ln2g = vech_ref[4]
        ln2b = vech_ref[5]

        # --- fused Q/K/V projection: one (M, H) @ (H, 3H) matmul -----------
        qkv = jnp.dot(x_bf, wqkv_ref[...], preferred_element_type=jnp.float32)
        qkv = qkv + vecw_ref[0, :3 * H]
        q = qkv[:, :H].astype(jnp.bfloat16)          # 1/sqrt(H) folded into Wq
        k = qkv[:, H:2 * H].astype(jnp.bfloat16)
        v = qkv[:, 2 * H:].astype(jnp.bfloat16)

        # --- attention scores + online softmax ------------------------------
        if flat_scores:
            # One (M, M) score matmul; additive mask is block-diagonal per
            # (chunk, batch) sequence + key padding (precomputed in wrapper).
            s = jax.lax.dot_general(q, k, (((1,), (1,)), ((), ())),
                                    preferred_element_type=jnp.float32)
            s = s + bias_ref[0]
            s = s - jnp.max(s, axis=-1, keepdims=True)
            p = jnp.exp(s)
            p = p * pl.reciprocal(jnp.sum(p, axis=-1, keepdims=True), approx=True)
            attn = jnp.dot(p.astype(jnp.bfloat16), v,
                           preferred_element_type=jnp.float32)
        else:
            qb = q.reshape(CB, L, H)
            kb = k.reshape(CB, L, H)
            vb = v.reshape(CB, L, H)
            key_bias = bias_ref[...].reshape(CB, L)
            s = jnp.einsum('bqd,bkd->bqk', qb, kb,
                           preferred_element_type=jnp.float32)
            s = s + key_bias[:, None, :]
            s = s - jnp.max(s, axis=-1, keepdims=True)
            p = jnp.exp(s)
            p = p * pl.reciprocal(jnp.sum(p, axis=-1, keepdims=True), approx=True)
            attn = jnp.einsum('bqk,bkd->bqd', p.astype(jnp.bfloat16), vb,
                              preferred_element_type=jnp.float32).reshape(M, H)

        attn = jnp.dot(attn.astype(jnp.bfloat16), wo_ref[...],
                       preferred_element_type=jnp.float32) + bo
        x = _layernorm(x + attn, ln1g, ln1b)

        # --- feed-forward, tiled over F so the (M, F_tile) stays in VMEM ----
        # TODO(synk): jax.nn.gelu(approximate=True) is the tanh GELU; HF BERT
        # uses the exact erf GELU (small systematic divergence).
        xb = x.astype(jnp.bfloat16)
        n_ft = F // f_tile
        if n_ft == 1:
            h = jnp.dot(xb, w1_ref[...],
                        preferred_element_type=jnp.float32) + vecw_ref[1, :F]
            h = jax.nn.gelu(h, approximate=True)
            ffn = jnp.dot(h.astype(jnp.bfloat16), w2_ref[...],
                          preferred_element_type=jnp.float32)
        else:
            def ffn_tile(t, acc):
                f0 = pl.multiple_of(t * f_tile, 128)
                ht = jnp.dot(xb, w1_ref[:, pl.ds(f0, f_tile)],
                             preferred_element_type=jnp.float32)
                ht = ht + vecw_ref[1, pl.ds(f0, f_tile)]
                ht = jax.nn.gelu(ht, approximate=True)
                return acc + jnp.dot(ht.astype(jnp.bfloat16),
                                     w2_ref[pl.ds(f0, f_tile), :],
                                     preferred_element_type=jnp.float32)

            ffn = jax.lax.fori_loop(0, n_ft, ffn_tile,
                                    jnp.zeros((M, H), jnp.float32))
        ffn = ffn + b2
        x = _layernorm(x + ffn, ln2g, ln2b)
        # TODO(synk): at very large B*L also tile the M axis (rows) to bound
        # live f32 intermediates on v5e's single vector-store slot.

        # --- CLS token (target_token_idx = 0) + final projection ------------
        cls = x.reshape(CB, L, H)[:, 0, :]                           # (CB, H)
        out = jnp.dot(cls.astype(jnp.bfloat16), wl_ref[...],
                      preferred_element_type=jnp.float32) + vecw_ref[2, :E_pad]
        out_ref[...] = out.reshape(C, B, E_pad).astype(out_ref.dtype)

    return kernel


# ---------------------------------------------------------------------------
# configuration helpers
# ---------------------------------------------------------------------------
def _device_config():
    kind = ""
    try:
        kind = jax.devices()[0].device_kind.lower()
    except Exception:
        pass
    if "v7" in kind:
        # 64 MiB VMEM per TensorCore; keep headroom, keep chunk axis parallel.
        return dict(vmem_limit=48 * 1024 * 1024, act_depth=2, merge_chunks=False)
    if "v5" in kind or "v6" in kind:
        # 128 MiB VMEM; give the pipeline more residency/buffer depth.
        return dict(vmem_limit=96 * 1024 * 1024, act_depth=3, merge_chunks=True)
    return dict(vmem_limit=32 * 1024 * 1024, act_depth=2, merge_chunks=True)


def _chunks_per_step(num, B, L, merge):
    if not merge:
        return 1
    best = 1
    for c in range(1, num + 1):
        if num % c == 0 and c * B * L <= 512:
            best = c
    return best


def _ffn_tile(F):
    if F <= 1024:
        return F
    for t in range(1024, 0, -128):
        if F % t == 0:
            return t
    return F


@functools.lru_cache(maxsize=None)
def _buffered_spec_ok(count):
    """Narrow feature probe: does this jax support pipeline_mode=pl.Buffered?"""
    if not hasattr(pl, "Buffered"):
        return False
    try:
        def k(x_ref, o_ref):
            o_ref[...] = x_ref[...]

        x = jnp.zeros((8, 128), jnp.float32)
        spec = pl.BlockSpec((8, 128), lambda i: (0, 0),
                            pipeline_mode=pl.Buffered(count))
        out = pl.pallas_call(
            k, out_shape=jax.ShapeDtypeStruct((8, 128), jnp.float32),
            grid=(1,), in_specs=[spec],
            out_specs=pl.BlockSpec((8, 128), lambda i: (0, 0)))(x)
        jax.block_until_ready(out)
        return True
    except Exception:
        return False


# ---------------------------------------------------------------------------
# parameters (stand-in for the pretrained backbone) and forward wrapper
# ---------------------------------------------------------------------------
def make_params(key, vocab_size, hidden, ffn, emb_dim, max_length):
    ks = jax.random.split(key, 10)
    init = lambda k, shape, s=0.02: (s * jax.random.normal(k, shape)).astype(jnp.float32)
    return dict(
        tok_emb=init(ks[0], (vocab_size, hidden)),
        pos_emb=init(ks[1], (max_length, hidden)),
        wq=init(ks[2], (hidden, hidden)), bq=jnp.zeros((hidden,), jnp.float32),
        wk=init(ks[3], (hidden, hidden)), bk=jnp.zeros((hidden,), jnp.float32),
        wv=init(ks[4], (hidden, hidden)), bv=jnp.zeros((hidden,), jnp.float32),
        wo=init(ks[5], (hidden, hidden)), bo=jnp.zeros((hidden,), jnp.float32),
        ln1g=jnp.ones((hidden,), jnp.float32), ln1b=jnp.zeros((hidden,), jnp.float32),
        w1=init(ks[6], (hidden, ffn)), b1=jnp.zeros((ffn,), jnp.float32),
        w2=init(ks[7], (ffn, hidden)), b2=jnp.zeros((hidden,), jnp.float32),
        ln2g=jnp.ones((hidden,), jnp.float32), ln2b=jnp.zeros((hidden,), jnp.float32),
        # nn.Linear(hidden_size, embedding_dim): weight (E, H), bias (E,)
        wl=init(ks[8], (emb_dim, hidden)), bl=jnp.zeros((emb_dim,), jnp.float32),
    )


def text_encoder_forward(input_ids, attention_mask, params, max_length):
    B, total_len = input_ids.shape
    L = max_length
    num = total_len // L
    H = params['tok_emb'].shape[1]
    F = params['w1'].shape[1]
    E = params['wl'].shape[0]
    E_pad = max(128, ((E + 127) // 128) * 128)

    cfg = _device_config()
    C = _chunks_per_step(num, B, L, cfg['merge_chunks'])
    S = num // C                      # grid steps
    M = C * B * L                     # rows per step
    flat_scores = M <= 512
    f_tile = _ffn_tile(F)

    # ---- glue: chunk, embed (bf16 MXU activations), additive key mask ------
    ids_c = input_ids.reshape(B, num, L).transpose(1, 0, 2)          # (num, B, L)
    mask_c = attention_mask.reshape(B, num, L).transpose(1, 0, 2)    # (num, B, L)
    emb = (params['tok_emb'][ids_c] + params['pos_emb'][None, None]
           ).astype(jnp.bfloat16)                                    # (num, B, L, H)

    key_pad = (mask_c.astype(jnp.float32) - 1.0) * 1e9               # 0 valid, -1e9 pad
    if flat_scores:
        # Block-diagonal (per (chunk, batch) sequence) + key-padding bias.
        seq_id = jnp.arange(M) // L
        block = jnp.where(seq_id[:, None] == seq_id[None, :], 0.0, -1e9
                          ).astype(jnp.float32)                      # (M, M)
        bias = key_pad.reshape(S, M)[:, None, :] + block[None]       # (S, M, M)
    else:
        bias = key_pad                                               # (num, B, L)

    # ---- weights: fused QKV, [in,out] layout, bf16 MXU operands ------------
    bf16 = lambda w: w.astype(jnp.bfloat16)
    scale = float(H) ** -0.5
    wqkv = bf16(jnp.concatenate(
        [params['wq'] * scale, params['wk'], params['wv']], axis=1))  # (H, 3H)
    bqkv = jnp.concatenate([params['bq'], params['bk'], params['bv']])  # (3H,)
    wl_pad = jnp.zeros((H, E_pad), jnp.float32).at[:, :E].set(params['wl'].T)
    bl_pad = jnp.zeros((E_pad,), jnp.float32).at[:E].set(params['bl'])

    # Packed 1-D params: vec_h rows = [bo, ln1g, ln1b, b2, ln2g, ln2b]
    vec_h = jnp.stack([params['bo'], params['ln1g'], params['ln1b'],
                       params['b2'], params['ln2g'], params['ln2b']])  # (6, H)
    W = max(3 * H, F, E_pad)
    vec_w = jnp.zeros((3, W), jnp.float32)
    vec_w = vec_w.at[0, :3 * H].set(bqkv)
    vec_w = vec_w.at[1, :F].set(params['b1'])
    vec_w = vec_w.at[2, :E_pad].set(bl_pad)

    weights = [wqkv, bf16(params['wo']), bf16(params['w1']),
               bf16(params['w2']), bf16(wl_pad), vec_h, vec_w]

    # ---- BlockSpecs ---------------------------------------------------------
    weights_single_buffer = _buffered_spec_ok(1)
    act_depth = max(2, min(cfg['act_depth'], S))
    acts_deep_buffer = act_depth != 2 and _buffered_spec_ok(act_depth)

    def const_spec(arr):
        nd = arr.ndim
        idx = lambda g, _nd=nd: (0,) * _nd
        if weights_single_buffer:
            # Weight blocks never change across the grid: single-buffer them.
            return pl.BlockSpec(arr.shape, idx, pipeline_mode=pl.Buffered(1))
        return pl.BlockSpec(arr.shape, idx)

    def act_spec(block, idx):
        if acts_deep_buffer:
            return pl.BlockSpec(block, idx, pipeline_mode=pl.Buffered(act_depth))
        return pl.BlockSpec(block, idx)

    if flat_scores:
        bias_spec = act_spec((1, M, M), lambda g: (g, 0, 0))
    else:
        bias_spec = act_spec((C, B, L), lambda g: (g, 0, 0))

    in_specs = ([act_spec((C, B, L, H), lambda g: (g, 0, 0, 0)), bias_spec]
                + [const_spec(w) for w in weights])
    out_spec = pl.BlockSpec((C, B, E_pad), lambda g: (g, 0, 0))

    kernel = make_text_encoder_kernel(C, B, L, H, F, E_pad, flat_scores, f_tile)
    out = pl.pallas_call(
        kernel,
        out_shape=jax.ShapeDtypeStruct((num, B, E_pad), jnp.bfloat16),
        grid_spec=pltpu.PrefetchScalarGridSpec(
            num_scalar_prefetch=0,
            grid=(S,),
            in_specs=in_specs,
            out_specs=out_spec,
        ),
        compiler_params=pltpu.CompilerParams(
            # steps are independent -> shard across both TCs on v7x
            dimension_semantics=("parallel",),
            vmem_limit_bytes=cfg['vmem_limit'],
        ),
    )(emb, bias, *weights)

    # TextEncoder.forward returns a Python list of per-chunk (B, E) embeddings.
    return [out[i, :, :E] for i in range(num)]


if __name__ == "__main__":
    # Small, lane-friendly shapes consistent with the module:
    #   batch=2, max_length=16, 2 chunks -> seq=32, hidden_size=128,
    #   ffn=256, embedding_dim=64 (padded to 128 lanes), vocab=100
    B, L, NUM, H, F, E, VOCAB = 2, 16, 2, 128, 256, 64, 100

    key = jax.random.PRNGKey(0)
    k_ids, k_par = jax.random.split(key)

    input_ids = jax.random.randint(k_ids, (B, NUM * L), 0, VOCAB, dtype=jnp.int32)
    attention_mask = jnp.ones((B, NUM * L), dtype=jnp.int32)
    attention_mask = attention_mask.at[:, -4:].set(0)   # some padding in last chunk

    params = make_params(k_par, VOCAB, H, F, E, L)

    outs = text_encoder_forward(input_ids, attention_mask, params, max_length=L)
    for o in outs:
        jax.block_until_ready(o)
        assert o.shape == (B, E)

    print("KERNEL_OK")
</pallas_src>

<mosaic_0001>
module attributes {stable_mosaic.version = 11 : i64} {
  func.func @k(%arg0: i32, %arg1: memref<8x128xf32, #tpu.memory_space<vmem>>, %arg2: memref<8x128xf32, #tpu.memory_space<vmem>>) attributes {dimension_semantics = [#tpu.dimension_semantics<arbitrary>], iteration_bounds = array<i64: 1>, scalar_prefetch = 0 : i64, scratch_operands = 0 : i64, tpu.core_type = #tpu.core_type<tc>, window_params = [{pipeline_mode = #tpu.pipeline_mode<synchronous>, transform_indices = @transform_0, window_bounds = array<i64: 8, 128>}, {pipeline_mode = #tpu.pipeline_mode<synchronous>, transform_indices = @transform_1, window_bounds = array<i64: 8, 128>}]} {
    %c0 = arith.constant 0 : index
    %c0_0 = arith.constant 0 : index
    %0 = vector.load %arg1[%c0, %c0_0] : memref<8x128xf32, #tpu.memory_space<vmem>>, vector<8x128xf32>
    %c0_1 = arith.constant 0 : index
    %c0_2 = arith.constant 0 : index
    %1 = vector.load %arg2[%c0_1, %c0_2] : memref<8x128xf32, #tpu.memory_space<vmem>>, vector<8x128xf32>
    tpu.vector_store %arg2[%c0_1, %c0_2], %0 {strides = array<i32>} : memref<8x128xf32, #tpu.memory_space<vmem>>, vector<8x128xf32>,
    return
  }
  func.func @transform_0(%arg0: i32) -> (i32, i32) {
    %c0_i32 = arith.constant 0 : i32
    %c0_i32_0 = arith.constant 0 : i32
    %c0_i32_1 = arith.constant 0 : i32
    return %c0_i32, %c0_i32_0 : i32, i32
  }
  func.func @transform_1(%arg0: i32) -> (i32, i32) {
    %c0_i32 = arith.constant 0 : i32
    %c0_i32_0 = arith.constant 0 : i32
    %c0_i32_1 = arith.constant 0 : i32
    return %c0_i32, %c0_i32_0 : i32, i32
  }
}

module attributes {stable_mosaic.version = 11 : i64} {
  func.func @kernel(%arg0: i32, %arg1: memref<2x2x16x128xbf16, #tpu.memory_space<vmem>>, %arg2: memref<1x64x64xf32, #tpu.memory_space<vmem>>, %arg3: memref<128x384xbf16, #tpu.memory_space<vmem>>, %arg4: memref<128x128xbf16, #tpu.memory_space<vmem>>, %arg5: memref<128x256xbf16, #tpu.memory_space<vmem>>, %arg6: memref<256x128xbf16, #tpu.memory_space<vmem>>, %arg7: memref<128x128xbf16, #tpu.memory_space<vmem>>, %arg8: memref<6x128xf32, #tpu.memory_space<vmem>>, %arg9: memref<3x384xf32, #tpu.memory_space<vmem>>, %arg10: memref<2x2x128xbf16, #tpu.memory_space<vmem>>) attributes {dimension_semantics = [#tpu.dimension_semantics<parallel>], iteration_bounds = array<i64: 1>, scalar_prefetch = 0 : i64, scratch_operands = 0 : i64, tpu.core_type = #tpu.core_type<tc>, window_params = [{transform_indices = @transform_0, window_bounds = array<i64: 2, 2, 16, 128>}, {transform_indices = @transform_1, window_bounds = array<i64: 1, 64, 64>}, {pipeline_mode = #tpu.pipeline_mode<synchronous>, transform_indices = @transform_2, window_bounds = array<i64: 128, 384>}, {pipeline_mode = #tpu.pipeline_mode<synchronous>, transform_indices = @transform_3, window_bounds = array<i64: 128, 128>}, {pipeline_mode = #tpu.pipeline_mode<synchronous>, transform_indices = @transform_4, window_bounds = array<i64: 128, 256>}, {pipeline_mode = #tpu.pipeline_mode<synchronous>, transform_indices = @transform_5, window_bounds = array<i64: 256, 128>}, {pipeline_mode = #tpu.pipeline_mode<synchronous>, transform_indices = @transform_6, window_bounds = array<i64: 128, 128>}, {pipeline_mode = #tpu.pipeline_mode<synchronous>, transform_indices = @transform_7, window_bounds = array<i64: 6, 128>}, {pipeline_mode = #tpu.pipeline_mode<synchronous>, transform_indices = @transform_8, window_bounds = array<i64: 3, 384>}, {transform_indices = @transform_9, window_bounds = array<i64: 2, 2, 128>}]} {
    %c0 = arith.constant 0 : index
    %c0_0 = arith.constant 0 : index
    %c0_1 = arith.constant 0 : index
    %c0_2 = arith.constant 0 : index
    %0 = vector.load %arg1[%c0, %c0_0, %c0_1, %c0_2] : memref<2x2x16x128xbf16, #tpu.memory_space<vmem>>, vector<2x2x16x128xbf16>
    %1 = vector.shape_cast %0 : vector<2x2x16x128xbf16> to vector<64x128xbf16>
    %2 = arith.extf %1 : vector<64x128xbf16> to vector<64x128xf32>
    %c0_3 = arith.constant 0 : index
    %c0_4 = arith.constant 0 : index
    %3 = vector.load %arg8[%c0_3, %c0_4] : memref<6x128xf32, #tpu.memory_space<vmem>>, vector<1x128xf32>
    %4 = vector.shape_cast %3 : vector<1x128xf32> to vector<128xf32>
    %c1 = arith.constant 1 : index
    %c0_5 = arith.constant 0 : index
    %5 = vector.load %arg8[%c1, %c0_5] : memref<6x128xf32, #tpu.memory_space<vmem>>, vector<1x128xf32>
    %6 = vector.shape_cast %5 : vector<1x128xf32> to vector<128xf32>
    %c2 = arith.constant 2 : index
    %c0_6 = arith.constant 0 : index
    %7 = vector.load %arg8[%c2, %c0_6] : memref<6x128xf32, #tpu.memory_space<vmem>>, vector<1x128xf32>
    %8 = vector.shape_cast %7 : vector<1x128xf32> to vector<128xf32>
    %c3 = arith.constant 3 : index
    %c0_7 = arith.constant 0 : index
    %9 = vector.load %arg8[%c3, %c0_7] : memref<6x128xf32, #tpu.memory_space<vmem>>, vector<1x128xf32>
    %10 = vector.shape_cast %9 : vector<1x128xf32> to vector<128xf32>
    %c4 = arith.constant 4 : index
    %c0_8 = arith.constant 0 : index
    %11 = vector.load %arg8[%c4, %c0_8] : memref<6x128xf32, #tpu.memory_space<vmem>>, vector<1x128xf32>
    %12 = vector.shape_cast %11 : vector<1x128xf32> to vector<128xf32>
    %c5 = arith.constant 5 : index
    %c0_9 = arith.constant 0 : index
    %13 = vector.load %arg8[%c5, %c0_9] : memref<6x128xf32, #tpu.memory_space<vmem>>, vector<1x128xf32>
    %14 = vector.shape_cast %13 : vector<1x128xf32> to vector<128xf32>
    %c0_10 = arith.constant 0 : index
    %c0_11 = arith.constant 0 : index
    %15 = vector.load %arg3[%c0_10, %c0_11] : memref<128x384xbf16, #tpu.memory_space<vmem>>, vector<128x384xbf16>
    %cst = arith.constant dense<0.000000e+00> : vector<64x384xf32>
    %16 = tpu.matmul %1, %15, %cst {dimension_numbers = #tpu.dot_dimension_numbers<[1], [0], [0], [1], [0, 0, 1, 1], [], []>} : vector<64x128xbf16>, vector<128x384xbf16>, vector<64x384xf32> -> vector<64x384xf32>
    %c0_12 = arith.constant 0 : index
    %c0_13 = arith.constant 0 : index
    %17 = vector.load %arg9[%c0_12, %c0_13] : memref<3x384xf32, #tpu.memory_space<vmem>>, vector<1x384xf32>
    %18 = vector.shape_cast %17 : vector<1x384xf32> to vector<384xf32>
    %19 = vector.shape_cast %18 : vector<384xf32> to vector<1x384xf32>
    %20 = vector.broadcast %19 : vector<1x384xf32> to vector<64x384xf32>
    %21 = arith.addf %16, %20 : vector<64x384xf32>
    %22 = vector.extract_strided_slice %21 {offsets = [0, 0], sizes = [64, 128], strides = [1, 1]} : vector<64x384xf32> to vector<64x128xf32>
    %23 = arith.truncf %22 : vector<64x128xf32> to vector<64x128xbf16>
    %24 = vector.extract_strided_slice %21 {offsets = [0, 128], sizes = [64, 128], strides = [1, 1]} : vector<64x384xf32> to vector<64x128xf32>
    %25 = arith.truncf %24 : vector<64x128xf32> to vector<64x128xbf16>
    %26 = vector.extract_strided_slice %21 {offsets = [0, 256], sizes = [64, 128], strides = [1, 1]} : vector<64x384xf32> to vector<64x128xf32>
    %27 = arith.truncf %26 : vector<64x128xf32> to vector<64x128xbf16>
    %cst_14 = arith.constant dense<0.000000e+00> : vector<64x64xf32>
    %28 = tpu.matmul %23, %25, %cst_14 {dimension_numbers = #tpu.dot_dimension_numbers<[1], [1], [0], [0], [0, 0, 1, 0], [], []>} : vector<64x128xbf16>, vector<64x128xbf16>, vector<64x64xf32> -> vector<64x64xf32>
    %c0_15 = arith.constant 0 : index
    %c0_16 = arith.constant 0 : index
    %c0_17 = arith.constant 0 : index
    %29 = vector.load %arg2[%c0_15, %c0_16, %c0_17] : memref<1x64x64xf32, #tpu.memory_space<vmem>>, vector<1x64x64xf32>
    %30 = vector.shape_cast %29 : vector<1x64x64xf32> to vector<64x64xf32>
    %31 = arith.addf %28, %30 : vector<64x64xf32>
    %cst_18 = arith.constant dense<0xFF800000> : vector<64xf32>
    %32 = vector.multi_reduction <maximumf>, %31, %cst_18 [1] : vector<64x64xf32> to vector<64xf32>
    %33 = vector.shape_cast %32 : vector<64xf32> to vector<64x1xf32>
    %34 = vector.broadcast %33 : vector<64x1xf32> to vector<64x64xf32>
    %35 = arith.subf %31, %34 : vector<64x64xf32>
    %36 = math.exp %35 : vector<64x64xf32>
    %cst_19 = arith.constant dense<0.000000e+00> : vector<64xf32>
    %37 = vector.multi_reduction <add>, %36, %cst_19 [1] : vector<64x64xf32> to vector<64xf32>
    %38 = vector.shape_cast %37 : vector<64xf32> to vector<64x1xf32>
    %39 = tpu.reciprocal %38 {approx = true} : vector<64x1xf32> -> vector<64x1xf32>
    %40 = vector.broadcast %39 : vector<64x1xf32> to vector<64x64xf32>
    %41 = arith.mulf %36, %40 : vector<64x64xf32>
    %42 = arith.truncf %41 : vector<64x64xf32> to vector<64x64xbf16>
    %cst_20 = arith.constant dense<0.000000e+00> : vector<64x128xf32>
    %43 = tpu.matmul %42, %27, %cst_20 {dimension_numbers = #tpu.dot_dimension_numbers<[1], [0], [0], [1], [0, 0, 1, 1], [], []>} : vector<64x64xbf16>, vector<64x128xbf16>, vector<64x128xf32> -> vector<64x128xf32>
    %44 = arith.truncf %43 : vector<64x128xf32> to vector<64x128xbf16>
    %c0_21 = arith.constant 0 : index
    %c0_22 = arith.constant 0 : index
    %45 = vector.load %arg4[%c0_21, %c0_22] : memref<128x128xbf16, #tpu.memory_space<vmem>>, vector<128x128xbf16>
    %cst_23 = arith.constant dense<0.000000e+00> : vector<64x128xf32>
    %46 = tpu.matmul %44, %45, %cst_23 {dimension_numbers = #tpu.dot_dimension_numbers<[1], [0], [0], [1], [0, 0, 1, 1], [], []>} : vector<64x128xbf16>, vector<128x128xbf16>, vector<64x128xf32> -> vector<64x128xf32>
    %47 = vector.shape_cast %4 : vector<128xf32> to vector<1x128xf32>
    %48 = vector.broadcast %47 : vector<1x128xf32> to vector<64x128xf32>
    %49 = arith.addf %46, %48 : vector<64x128xf32>
    %50 = arith.addf %2, %49 : vector<64x128xf32>
    %cst_24 = arith.constant dense<0.000000e+00> : vector<64xf32>
    %51 = vector.multi_reduction <add>, %50, %cst_24 [1] : vector<64x128xf32> to vector<64xf32>
    %52 = vector.shape_cast %51 : vector<64xf32> to vector<64x1xf32>
    %cst_25 = arith.constant 1.280000e+02 : f32
    %53 = vector.broadcast %cst_25 : f32 to vector<64x1xf32>
    %54 = arith.divf %52, %53 : vector<64x1xf32>
    %55 = vector.broadcast %54 : vector<64x1xf32> to vector<64x128xf32>
    %56 = arith.subf %50, %55 : vector<64x128xf32>
    %57 = arith.mulf %56, %56 : vector<64x128xf32>
    %cst_26 = arith.constant dense<0.000000e+00> : vector<64xf32>
    %58 = vector.multi_reduction <add>, %57, %cst_26 [1] : vector<64x128xf32> to vector<64xf32>
    %59 = vector.shape_cast %58 : vector<64xf32> to vector<64x1xf32>
    %cst_27 = arith.constant 1.280000e+02 : f32
    %60 = vector.broadcast %cst_27 : f32 to vector<64x1xf32>
    %61 = arith.divf %59, %60 : vector<64x1xf32>
    %62 = vector.broadcast %54 : vector<64x1xf32> to vector<64x128xf32>
    %63 = arith.subf %50, %62 : vector<64x128xf32>
    %cst_28 = arith.constant 9.99999996E-13 : f32
    %64 = vector.broadcast %cst_28 : f32 to vector<64x1xf32>
    %65 = arith.addf %61, %64 : vector<64x1xf32>
    %66 = math.rsqrt %65 : vector<64x1xf32>
    %67 = vector.broadcast %66 : vector<64x1xf32> to vector<64x128xf32>
    %68 = arith.mulf %63, %67 : vector<64x128xf32>
    %69 = vector.shape_cast %6 : vector<128xf32> to vector<1x128xf32>
    %70 = vector.broadcast %69 : vector<1x128xf32> to vector<64x128xf32>
    %71 = arith.mulf %68, %70 : vector<64x128xf32>
    %72 = vector.shape_cast %8 : vector<128xf32> to vector<1x128xf32>
    %73 = vector.broadcast %72 : vector<1x128xf32> to vector<64x128xf32>
    %74 = arith.addf %71, %73 : vector<64x128xf32>
    %75 = arith.truncf %74 : vector<64x128xf32> to vector<64x128xbf16>
    %c0_29 = arith.constant 0 : index
    %c0_30 = arith.constant 0 : index
    %76 = vector.load %arg5[%c0_29, %c0_30] : memref<128x256xbf16, #tpu.memory_space<vmem>>, vector<128x256xbf16>
    %cst_31 = arith.constant dense<0.000000e+00> : vector<64x256xf32>
    %77 = tpu.matmul %75, %76, %cst_31 {dimension_numbers = #tpu.dot_dimension_numbers<[1], [0], [0], [1], [0, 0, 1, 1], [], []>} : vector<64x128xbf16>, vector<128x256xbf16>, vector<64x256xf32> -> vector<64x256xf32>
    %c1_32 = arith.constant 1 : index
    %c0_33 = arith.constant 0 : index
    %78 = vector.load %arg9[%c1_32, %c0_33] : memref<3x384xf32, #tpu.memory_space<vmem>>, vector<1x256xf32>
    %79 = vector.shape_cast %78 : vector<1x256xf32> to vector<256xf32>
    %80 = vector.shape_cast %79 : vector<256xf32> to vector<1x256xf32>
    %81 = vector.broadcast %80 : vector<1x256xf32> to vector<64x256xf32>
    %82 = arith.addf %77, %81 : vector<64x256xf32>
    %83 = arith.mulf %82, %82 : vector<64x256xf32>
    %84 = arith.mulf %82, %83 : vector<64x256xf32>
    %cst_34 = arith.constant 4.471500e-02 : f32
    %85 = vector.broadcast %cst_34 : f32 to vector<64x256xf32>
    %86 = arith.mulf %85, %84 : vector<64x256xf32>
    %87 = arith.addf %82, %86 : vector<64x256xf32>
    %cst_35 = arith.constant 0.797884583 : f32
    %88 = vector.broadcast %cst_35 : f32 to vector<64x256xf32>
    %89 = arith.mulf %88, %87 : vector<64x256xf32>
    %90 = math.tanh %89 : vector<64x256xf32>
    %cst_36 = arith.constant 1.000000e+00 : f32
    %91 = vector.broadcast %cst_36 : f32 to vector<64x256xf32>
    %92 = arith.addf %91, %90 : vector<64x256xf32>
    %cst_37 = arith.constant 5.000000e-01 : f32
    %93 = vector.broadcast %cst_37 : f32 to vector<64x256xf32>
    %94 = arith.mulf %93, %92 : vector<64x256xf32>
    %95 = arith.mulf %82, %94 : vector<64x256xf32>
    %96 = arith.truncf %95 : vector<64x256xf32> to vector<64x256xbf16>
    %c0_38 = arith.constant 0 : index
    %c0_39 = arith.constant 0 : index
    %97 = vector.load %arg6[%c0_38, %c0_39] : memref<256x128xbf16, #tpu.memory_space<vmem>>, vector<256x128xbf16>
    %cst_40 = arith.constant dense<0.000000e+00> : vector<64x128xf32>
    %98 = tpu.matmul %96, %97, %cst_40 {dimension_numbers = #tpu.dot_dimension_numbers<[1], [0], [0], [1], [0, 0, 1, 1], [], []>} : vector<64x256xbf16>, vector<256x128xbf16>, vector<64x128xf32> -> vector<64x128xf32>
    %99 = vector.shape_cast %10 : vector<128xf32> to vector<1x128xf32>
    %100 = vector.broadcast %99 : vector<1x128xf32> to vector<64x128xf32>
    %101 = arith.addf %98, %100 : vector<64x128xf32>
    %102 = arith.addf %74, %101 : vector<64x128xf32>
    %cst_41 = arith.constant dense<0.000000e+00> : vector<64xf32>
    %103 = vector.multi_reduction <add>, %102, %cst_41 [1] : vector<64x128xf32> to vector<64xf32>
    %104 = vector.shape_cast %103 : vector<64xf32> to vector<64x1xf32>
    %cst_42 = arith.constant 1.280000e+02 : f32
    %105 = vector.broadcast %cst_42 : f32 to vector<64x1xf32>
    %106 = arith.divf %104, %105 : vector<64x1xf32>
    %107 = vector.broadcast %106 : vector<64x1xf32> to vector<64x128xf32>
    %108 = arith.subf %102, %107 : vector<64x128xf32>
    %109 = arith.mulf %108, %108 : vector<64x128xf32>
    %cst_43 = arith.constant dense<0.000000e+00> : vector<64xf32>
    %110 = vector.multi_reduction <add>, %109, %cst_43 [1] : vector<64x128xf32> to vector<64xf32>
    %111 = vector.shape_cast %110 : vector<64xf32> to vector<64x1xf32>
    %cst_44 = arith.constant 1.280000e+02 : f32
    %112 = vector.broadcast %cst_44 : f32 to vector<64x1xf32>
    %113 = arith.divf %111, %112 : vector<64x1xf32>
    %114 = vector.broadcast %106 : vector<64x1xf32> to vector<64x128xf32>
    %115 = arith.subf %102, %114 : vector<64x128xf32>
    %cst_45 = arith.constant 9.99999996E-13 : f32
    %116 = vector.broadcast %cst_45 : f32 to vector<64x1xf32>
    %117 = arith.addf %113, %116 : vector<64x1xf32>
    %118 = math.rsqrt %117 : vector<64x1xf32>
    %119 = vector.broadcast %118 : vector<64x1xf32> to vector<64x128xf32>
    %120 = arith.mulf %115, %119 : vector<64x128xf32>
    %121 = vector.shape_cast %12 : vector<128xf32> to vector<1x128xf32>
    %122 = vector.broadcast %121 : vector<1x128xf32> to vector<64x128xf32>
    %123 = arith.mulf %120, %122 : vector<64x128xf32>
    %124 = vector.shape_cast %14 : vector<128xf32> to vector<1x128xf32>
    %125 = vector.broadcast %124 : vector<1x128xf32> to vector<64x128xf32>
    %126 = arith.addf %123, %125 : vector<64x128xf32>
    %127 = vector.shape_cast %126 : vector<64x128xf32> to vector<4x16x128xf32>
    %128 = vector.extract_strided_slice %127 {offsets = [0, 0, 0], sizes = [4, 1, 128], strides = [1, 1, 1]} : vector<4x16x128xf32> to vector<4x1x128xf32>
    %129 = vector.shape_cast %128 : vector<4x1x128xf32> to vector<4x128xf32>
    %130 = arith.truncf %129 : vector<4x128xf32> to vector<4x128xbf16>
    %c0_46 = arith.constant 0 : index
    %c0_47 = arith.constant 0 : index
    %131 = vector.load %arg7[%c0_46, %c0_47] : memref<128x128xbf16, #tpu.memory_space<vmem>>, vector<128x128xbf16>
    %cst_48 = arith.constant dense<0.000000e+00> : vector<4x128xf32>
    %132 = tpu.matmul %130, %131, %cst_48 {dimension_numbers = #tpu.dot_dimension_numbers<[1], [0], [0], [1], [0, 0, 1, 1], [], []>} : vector<4x128xbf16>, vector<128x128xbf16>, vector<4x128xf32> -> vector<4x128xf32>
    %c2_49 = arith.constant 2 : index
    %c0_50 = arith.constant 0 : index
    %133 = vector.load %arg9[%c2_49, %c0_50] : memref<3x384xf32, #tpu.memory_space<vmem>>, vector<1x128xf32>
    %134 = vector.shape_cast %133 : vector<1x128xf32> to vector<128xf32>
    %135 = vector.shape_cast %134 : vector<128xf32> to vector<1x128xf32>
    %136 = vector.broadcast %135 : vector<1x128xf32> to vector<4x128xf32>
    %137 = arith.addf %132, %136 : vector<4x128xf32>
    %138 = vector.shape_cast %137 : vector<4x128xf32> to vector<2x2x128xf32>
    %139 = arith.truncf %138 : vector<2x2x128xf32> to vector<2x2x128xbf16>
    %c0_51 = arith.constant 0 : index
    %c0_52 = arith.constant 0 : index
    %c0_53 = arith.constant 0 : index
    %140 = vector.load %arg10[%c0_51, %c0_52, %c0_53] : memref<2x2x128xbf16, #tpu.memory_space<vmem>>, vector<2x2x128xbf16>
    tpu.vector_store %arg10[%c0_51, %c0_52, %c0_53], %139 {strides = array<i32>} : memref<2x2x128xbf16, #tpu.memory_space<vmem>>, vector<2x2x128xbf16>,
    return
  }
  func.func @transform_0(%arg0: i32) -> (i32, i32, i32, i32) {
    %c0_i32 = arith.constant 0 : i32
    %c0_i32_0 = arith.constant 0 : i32
    %c0_i32_1 = arith.constant 0 : i32
    %c0_i32_2 = arith.constant 0 : i32
    return %arg0, %c0_i32, %c0_i32_0, %c0_i32_1 : i32, i32, i32, i32
  }
  func.func @transform_1(%arg0: i32) -> (i32, i32, i32) {
    %c0_i32 = arith.constant 0 : i32
    %c0_i32_0 = arith.constant 0 : i32
    %c0_i32_1 = arith.constant 0 : i32
    return %arg0, %c0_i32, %c0_i32_0 : i32, i32, i32
  }
  func.func @transform_2(%arg0: i32) -> (i32, i32) {
    %c0_i32 = arith.constant 0 : i32
    %c0_i32_0 = arith.constant 0 : i32
    %c0_i32_1 = arith.constant 0 : i32
    return %c0_i32, %c0_i32_0 : i32, i32
  }
  func.func @transform_3(%arg0: i32) -> (i32, i32) {
    %c0_i32 = arith.constant 0 : i32
    %c0_i32_0 = arith.constant 0 : i32
    %c0_i32_1 = arith.constant 0 : i32
    return %c0_i32, %c0_i32_0 : i32, i32
  }
  func.func @transform_4(%arg0: i32) -> (i32, i32) {
    %c0_i32 = arith.constant 0 : i32
    %c0_i32_0 = arith.constant 0 : i32
    %c0_i32_1 = arith.constant 0 : i32
    return %c0_i32, %c0_i32_0 : i32, i32
  }
  func.func @transform_5(%arg0: i32) -> (i32, i32) {
    %c0_i32 = arith.constant 0 : i32
    %c0_i32_0 = arith.constant 0 : i32
    %c0_i32_1 = arith.constant 0 : i32
    return %c0_i32, %c0_i32_0 : i32, i32
  }
  func.func @transform_6(%arg0: i32) -> (i32, i32) {
    %c0_i32 = arith.constant 0 : i32
    %c0_i32_0 = arith.constant 0 : i32
    %c0_i32_1 = arith.constant 0 : i32
    return %c0_i32, %c0_i32_0 : i32, i32
  }
  func.func @transform_7(%arg0: i32) -> (i32, i32) {
    %c0_i32 = arith.constant 0 : i32
    %c0_i32_0 = arith.constant 0 : i32
    %c0_i32_1 = arith.constant 0 : i32
    return %c0_i32, %c0_i32_0 : i32, i32
  }
  func.func @transform_8(%arg0: i32) -> (i32, i32) {
    %c0_i32 = arith.constant 0 : i32
    %c0_i32_0 = arith.constant 0 : i32
    %c0_i32_1 = arith.constant 0 : i32
    return %c0_i32, %c0_i32_0 : i32, i32
  }
  func.func @transform_9(%arg0: i32) -> (i32, i32, i32) {
    %c0_i32 = arith.constant 0 : i32
    %c0_i32_0 = arith.constant 0 : i32
    %c0_i32_1 = arith.constant 0 : i32
    return %arg0, %c0_i32, %c0_i32_0 : i32, i32, i32
  }
}

</mosaic_0001>

<bundles_post_ra>
// kernel: tpu_custom_call.1
= control target key start
LH: loop header
LB: loop body
LE: loop exit
PB: predicated region body
PF: predicated region fallthrough
CT: control target
= control target key end

     0   :  { %6 = vsyncpa [#allocation3], 0  ;;  %s124_s0 = inlined_call_operand.hbm [shape: f32[8,128], index: 0, kind: input, shape index: {}]   ;;  %s125_s1 = inlined_call_operand.hbm [shape: f32[8,128], index: 1, kind: output, shape index: {}]  }
   0x1   :  { %7 = vsyncpa [#allocation4], 0  ;;  %s88_s6 = smov [#allocation2]   ;;  %s40_s10 = scalar_lea.hbm %s124_s0, 128 }
   0x2   :  { %s14_s7 = sshll.u32 %s88_s6, 4  ;;  %p41_p0 = scmp.ne.s32.totalorder %s124_s0, %s40_s10  ;;  %s15_s7 = int_to_ptr.vmem [resolvable:$true] %s14_s7 }
   0x3   :  { %p44_p1 = scmp.lt.u32.totalorder %s40_s10, %s124_s0 }
   0x5   :  { %p46_p2 = pnand %p44_p1, %p41_p0 }
   0x7   :  { %49 = shalt.err (!%p46_p2)
}
   0x8   :  { %s50_s15 = scalar_lea.vmem %s15_s7, 128  ;;  %p55_p4 = scmp.lt.s32.totalorder %s15_s7, %s15_s7 }
   0x9   :  { %p51_p3 = scmp.ne.s32.totalorder %s15_s7, %s50_s15  ;;  %p56_p5 = scmp.lt.s32.totalorder %s50_s15, %s50_s15 }
   0xb   :  { %p57_p6 = por %p56_p5, %p55_p4 }
   0xd   :  { %p58_p7 = pnand %p57_p6, %p51_p3 }
   0xf   :  { %61 = shalt.err (!%p58_p7)
}
  0x10   :  { %17 = dma.hbm_to_vmem [thread:$0]  %s124_s0, 128, %s15_s7, [#allocation3]  }
  0x11   :  { %84 = dma.done.wait [#allocation3], 128  }
  0x12   :  { %85 = vsyncadd [#allocation3], 4294967168  ;;  %s89_s18 = smov [#allocation5]   ;;  %v21_v0 = vld [vmem:[#allocation2] sm:$0xff] }
  0x13   :  { %s29_s19 = sshll.u32 %s89_s18, 4  ;;  %22 = vst [vmem:[#allocation5] sm:$0xff] %v21_v0  ;;  %s30_s19 = int_to_ptr.vmem [resolvable:$true] %s29_s19 }
  0x14   :  { %s62_s20 = scalar_lea.vmem %s30_s19, 128  ;;  %p67_p9 = scmp.lt.s32.totalorder %s30_s19, %s30_s19 }
  0x15   :  { %p63_p8 = scmp.ne.s32.totalorder %s30_s19, %s62_s20  ;;  %p68_p10 = scmp.lt.s32.totalorder %s62_s20, %s62_s20 }
  0x17   :  { %p69_p11 = por %p68_p10, %p67_p9 }
  0x19   :  { %p70_p12 = pnand %p69_p11, %p63_p8 }
  0x1b   :  { %73 = shalt.err (!%p70_p12)
}
  0x1c   :  { %s74_s23 = scalar_lea.hbm %s125_s1, 128 }
  0x1d   :  { %p75_p13 = scmp.ne.s32.totalorder %s125_s1, %s74_s23  ;;  %p78_p0 = scmp.lt.u32.totalorder %s74_s23, %s125_s1 }
  0x1f   :  { %p80_p1 = pnand %p78_p0, %p75_p13 }
  0x21   :  { %83 = shalt.err (!%p80_p1)
}
  0x22   :  { %32 = dma.vmem_to_hbm [thread:$0]  %s30_s19, 128, %s125_s1, [#allocation4]  }
  0x23   :  { %86 = dma.done.wait [#allocation4], 128  }
  0x24   :  { %87 = vsyncadd [#allocation4], 4294967168 }
  0x25   :  { %36 = vsyncpa [#allocation3], 1 }
  0x26   :  { %37 = vsyncpa [#allocation4], 1 }

// kernel: tpu_custom_call.1
= control target key start
LH: loop header
LB: loop body
LE: loop exit
PB: predicated region body
PF: predicated region fallthrough
CT: control target
= control target key end

     0   :  { %14 = vsyncpa [#allocation3], 0  ;;  %s2925_s0 = inlined_call_operand.hbm [shape: bf16[2,2,16,128], index: 0, kind: input, shape index: {}]   ;;  %s2926_s1 = inlined_call_operand.hbm [shape: f32[1,64,64], index: 1, kind: input, shape index: {}]   ;;  %s2927_s2 = inlined_call_operand.hbm [shape: bf16[128,384], index: 2, kind: input, shape index: {}]   ;;  %s2928_s3 = inlined_call_operand.hbm [shape: bf16[128,128], index: 3, kind: input, shape index: {}]   ;;  %s2929_s4 = inlined_call_operand.hbm [shape: bf16[128,256], index: 4, kind: input, shape index: {}]   ;;  %s2930_s5 = inlined_call_operand.hbm [shape: bf16[256,128], index: 5, kind: input, shape index: {}]   ;;  %s2931_s6 = inlined_call_operand.hbm [shape: bf16[128,128], index: 6, kind: input, shape index: {}]   ;;  %s2932_s7 = inlined_call_operand.vmem [shape: f32[6,128], index: 7, kind: input, shape index: {}]   ;;  %s2933_s8 = inlined_call_operand.vmem [shape: f32[3,384], index: 8, kind: input, shape index: {}]   ;;  %s2934_s9 = inlined_call_operand.hbm [shape: bf16[2,2,128], index: 9, kind: output, shape index: {}]  }
   0x1   :  { %15 = vsyncpa [#allocation6], 0 }
   0x2   :  { %16 = vsyncpa [#allocation9], 0 }
   0x3   :  { %17 = vsyncpa [#allocation12], 0 }
   0x4   :  { %18 = vsyncpa [#allocation4], 0  ;;  %s2432_s30 = smov [#allocation5]   ;;  %s2246_s13 = scalar_lea.hbm %s2926_s1, 1024 }
   0x5   :  { %s36_s10 = sshll.u32 %s2432_s30, 4  ;;  %p2247_p0 = scmp.ne.s32.totalorder %s2926_s1, %s2246_s13  ;;  %s37_s10 = int_to_ptr.vmem [resolvable:$true] %s36_s10 }
   0x6   :  { %p2250_p1 = scmp.lt.u32.totalorder %s2246_s13, %s2926_s1 }
   0x8   :  { %p2252_p2 = pnand %p2250_p1, %p2247_p0 }
   0xa   :  { %2255 = shalt.err (!%p2252_p2)
}
   0xb   :  { %s2256_s18 = scalar_lea.vmem %s37_s10, 1024  ;;  %p2261_p4 = scmp.lt.s32.totalorder %s37_s10, %s37_s10 }
   0xc   :  { %p2257_p3 = scmp.ne.s32.totalorder %s37_s10, %s2256_s18  ;;  %p2262_p5 = scmp.lt.s32.totalorder %s2256_s18, %s2256_s18 }
   0xe   :  { %p2263_p6 = por %p2262_p5, %p2261_p4 }
  0x10   :  { %p2264_p7 = pnand %p2263_p6, %p2257_p3 }
  0x12   :  { %2267 = shalt.err (!%p2264_p7)
}
  0x13   :  { %s2433_s19 = smov 128   ;;  %s2434_s20 = smov 8  }
  0x14   :  { %42 = dma.hbm_to_vmem [thread:$0]  %s2926_s1, 1024, %s37_s10, [#allocation6], %s2433_s19, %s2433_s19, %s2434_s20  }
  0x15   :  { %s2435_s23 = smov [#allocation8]   ;;  %s2436_s25 = smov [#allocation11]  }
  0x16   :  { %s60_s24 = sshll.u32 %s2435_s23, 4  ;;  %s84_s26 = sshll.u32 %s2436_s25, 4  ;;  %s61_s24 = int_to_ptr.vmem [resolvable:$true] %s60_s24  ;;  %s85_s26 = int_to_ptr.vmem [resolvable:$true] %s84_s26 }
  0x17   :  { %s2268_s29 = scalar_lea.hbm %s2928_s3, 1024 }
  0x18   :  { %p2269_p8 = scmp.ne.s32.totalorder %s2928_s3, %s2268_s29  ;;  %p2272_p9 = scmp.lt.u32.totalorder %s2268_s29, %s2928_s3 }
  0x1a   :  { %p2274_p10 = pnand %p2272_p9, %p2269_p8 }
  0x1c   :  { %2277 = shalt.err (!%p2274_p10)
}
  0x1d   :  { %s2278_s1 = scalar_lea.vmem %s61_s24, 1024  ;;  %p2283_p12 = scmp.lt.s32.totalorder %s61_s24, %s61_s24 }
  0x1e   :  { %p2279_p11 = scmp.ne.s32.totalorder %s61_s24, %s2278_s1  ;;  %p2284_p13 = scmp.lt.s32.totalorder %s2278_s1, %s2278_s1 }
  0x20   :  { %p2285_p0 = por %p2284_p13, %p2283_p12 }
  0x22   :  { %p2286_p1 = pnand %p2285_p0, %p2279_p11 }
  0x24   :  { %2289 = shalt.err (!%p2286_p1)
}
  0x25   :  { %s2437_s10 = smov 64   ;;  %s2438_s14 = smov 4  }
  0x26   :  { %66 = dma.hbm_to_vmem [thread:$0]  %s2928_s3, 1024, %s61_s24, [#allocation9], %s2437_s10, %s2437_s10, %s2438_s14  }
  0x27   :  { %s2290_s21 = scalar_lea.hbm %s2930_s5, 2048 }
  0x28   :  { %p2291_p2 = scmp.ne.s32.totalorder %s2930_s5, %s2290_s21  ;;  %p2294_p3 = scmp.lt.u32.totalorder %s2290_s21, %s2930_s5 }
  0x2a   :  { %p2296_p4 = pnand %p2294_p3, %p2291_p2 }
  0x2c   :  { %2299 = shalt.err (!%p2296_p4)
}
  0x2d   :  { %s2300_s28 = scalar_lea.vmem %s85_s26, 2048  ;;  %p2305_p6 = scmp.lt.s32.totalorder %s85_s26, %s85_s26 }
  0x2e   :  { %p2301_p5 = scmp.ne.s32.totalorder %s85_s26, %s2300_s28  ;;  %p2306_p7 = scmp.lt.s32.totalorder %s2300_s28, %s2300_s28 }
  0x30   :  { %p2307_p8 = por %p2306_p7, %p2305_p6 }
  0x32   :  { %p2308_p9 = pnand %p2307_p8, %p2301_p5 }
  0x34   :  { %2311 = shalt.err (!%p2308_p9)
}
  0x35   :  { %90 = dma.hbm_to_vmem [thread:$0]  %s2930_s5, 2048, %s85_s26, [#allocation12], %s2437_s10, %s2437_s10, %s2438_s14  }
  0x36   :  { %s2439_s29 = smov [#allocation2]   ;;  %s2440_s11 = smov [#allocation7]  }
  0x37   :  { %s24_s30 = sshll.u32 %s2439_s29, 4  ;;  %s48_s12 = sshll.u32 %s2440_s11, 4  ;;  %s25_s30 = int_to_ptr.vmem [resolvable:$true] %s24_s30  ;;  %s49_s12 = int_to_ptr.vmem [resolvable:$true] %s48_s12 }
  0x38   :  { %s2312_s15 = scalar_lea.hbm %s2925_s0, 512 }
  0x39   :  { %p2313_p10 = scmp.ne.s32.totalorder %s2925_s0, %s2312_s15  ;;  %p2316_p11 = scmp.lt.u32.totalorder %s2312_s15, %s2925_s0 }
  0x3b   :  { %p2318_p12 = pnand %p2316_p11, %p2313_p10 }
  0x3d   :  { %2321 = shalt.err (!%p2318_p12)
}
  0x3e   :  { %s2322_s5 = scalar_lea.vmem %s25_s30, 512  ;;  %p2327_p0 = scmp.lt.s32.totalorder %s25_s30, %s25_s30 }
  0x3f   :  { %p2323_p13 = scmp.ne.s32.totalorder %s25_s30, %s2322_s5  ;;  %p2328_p1 = scmp.lt.s32.totalorder %s2322_s5, %s2322_s5 }
  0x41   :  { %p2329_p2 = por %p2328_p1, %p2327_p0 }
  0x43   :  { %p2330_p3 = pnand %p2329_p2, %p2323_p13 }
  0x45   :  { %2333 = shalt.err (!%p2330_p3)
}
  0x46   :  { %30 = dma.hbm_to_vmem [thread:$0]  %s2925_s0, 512, %s25_s30, [#allocation3], %s2437_s10, %s2437_s10, %s2438_s14  }
  0x47   :  { %s2334_s27 = scalar_lea.hbm %s2927_s2, 3072 }
  0x48   :  { %p2335_p4 = scmp.ne.s32.totalorder %s2927_s2, %s2334_s27  ;;  %p2338_p5 = scmp.lt.u32.totalorder %s2334_s27, %s2927_s2 }
  0x4a   :  { %p2340_p6 = pnand %p2338_p5, %p2335_p4 }
  0x4c   :  { %2343 = shalt.err (!%p2340_p6)
}
  0x4d   :  { %s2344_s11 = scalar_lea.vmem %s49_s12, 3072  ;;  %p2349_p8 = scmp.lt.s32.totalorder %s49_s12, %s49_s12 }
  0x4e   :  { %p2345_p7 = scmp.ne.s32.totalorder %s49_s12, %s2344_s11  ;;  %p2350_p9 = scmp.lt.s32.totalorder %s2344_s11, %s2344_s11 }
  0x50   :  { %p2351_p10 = por %p2350_p9, %p2349_p8 }
  0x52   :  { %p2352_p11 = pnand %p2351_p10, %p2345_p7 }
  0x54   :  { %2355 = shalt.err (!%p2352_p11)
}
  0x55   :  { %s2441_s0 = smov 192   ;;  %s2442_s30 = smov 12  }
  0x56   :  { %54 = dma.hbm_to_vmem [thread:$0]  %s2927_s2, 3072, %s49_s12, [#allocation6], %s2441_s0, %s2441_s0, %s2442_s30  }
  0x57   :  { %s2443_s15 = smov [#allocation10]   ;;  %s2444_s17 = smov [#allocation13]  }
  0x58   :  { %s72_s16 = sshll.u32 %s2443_s15, 4  ;;  %s96_s18 = sshll.u32 %s2444_s17, 4  ;;  %s73_s16 = int_to_ptr.vmem [resolvable:$true] %s72_s16  ;;  %s97_s18 = int_to_ptr.vmem [resolvable:$true] %s96_s18 }
  0x59   :  { %s2356_s26 = scalar_lea.hbm %s2929_s4, 2048 }
  0x5a   :  { %p2357_p12 = scmp.ne.s32.totalorder %s2929_s4, %s2356_s26  ;;  %p2360_p13 = scmp.lt.u32.totalorder %s2356_s26, %s2929_s4 }
  0x5c   :  { %p2362_p0 = pnand %p2360_p13, %p2357_p12 }
  0x5e   :  { %2365 = shalt.err (!%p2362_p0)
}
  0x5f   :  { %s2366_s2 = scalar_lea.vmem %s73_s16, 2048  ;;  %p2371_p2 = scmp.lt.s32.totalorder %s73_s16, %s73_s16 }
  0x60   :  { %p2367_p1 = scmp.ne.s32.totalorder %s73_s16, %s2366_s2  ;;  %p2372_p3 = scmp.lt.s32.totalorder %s2366_s2, %s2366_s2 }
  0x62   :  { %p2373_p4 = por %p2372_p3, %p2371_p2 }
  0x64   :  { %p2374_p5 = pnand %p2373_p4, %p2367_p1 }
  0x66   :  { %2377 = shalt.err (!%p2374_p5)
}
  0x67   :  { %78 = dma.hbm_to_vmem [thread:$0]  %s2929_s4, 2048, %s73_s16, [#allocation9], %s2433_s19, %s2433_s19, %s2434_s20  }
  0x68   :  { %s2378_s29 = scalar_lea.hbm %s2931_s6, 1024 }
  0x69   :  { %p2379_p6 = scmp.ne.s32.totalorder %s2931_s6, %s2378_s29  ;;  %p2382_p7 = scmp.lt.u32.totalorder %s2378_s29, %s2931_s6 }
  0x6b   :  { %p2384_p8 = pnand %p2382_p7, %p2379_p6 }
  0x6d   :  { %2387 = shalt.err (!%p2384_p8)
}
  0x6e   :  { %s2388_s1 = scalar_lea.vmem %s97_s18, 1024  ;;  %p2393_p10 = scmp.lt.s32.totalorder %s97_s18, %s97_s18 }
  0x6f   :  { %p2389_p9 = scmp.ne.s32.totalorder %s97_s18, %s2388_s1  ;;  %p2394_p11 = scmp.lt.s32.totalorder %s2388_s1, %s2388_s1 }
  0x71   :  { %p2395_p12 = por %p2394_p11, %p2393_p10 }
  0x73   :  { %p2396_p13 = pnand %p2395_p12, %p2389_p9 }
  0x75   :  { %2399 = shalt.err (!%p2396_p13)
}
  0x76   :  { %102 = dma.hbm_to_vmem [thread:$0]  %s2931_s6, 1024, %s97_s18, [#allocation12], %s2437_s10, %s2437_s10, %s2438_s14  }
  0x77   :  { %2422 = dma.done.wait [#allocation3], 512  }
  0x78   :  { %2423 = vsyncadd [#allocation3], 4294966784 }
  0x79   :  { %2424 = dma.done.wait [#allocation6], 4096  }
  0x7a   :  { %2425 = vsyncadd [#allocation6], 4294963200 }
  0x7b   :  { %2426 = dma.done.wait [#allocation9], 3072  }
  0x7c   :  { %2427 = vsyncadd [#allocation9], 4294964224 }
  0x7d   :  { %2428 = dma.done.wait [#allocation12], 3072  }
  0x7e   :  { %2429 = vsyncadd [#allocation12], 4294964224  ;;  %v2445_v0 = vmov 0   ;;  %v2062_v1 = vld [vmem:[#allocation7 + $0x4] ss:$12 sps:$4 sm:$0xff]   ;;  %v2608_v18 = vld [vmem:[#allocation2 + $0x8] sm:$0xff]   ;;  %v185_v21 = vlaneseq }
  0x7f   :  { %384 = vmatprep.mubr.bf16.mxu0 %v2445_v0  ;;  %v2064_v2 = vld [vmem:[#allocation7] ss:$12 sps:$4 sm:$0xff]   ;;  %352 = vmatprep.subr.bf16.mxu0 %v2062_v1  ;;  %v2065_v3 = vld [vmem:[#allocation7 + $0x1c] ss:$12 sps:$4 sm:$0xff]   ;;  %v2067_v4 = vld [vmem:[#allocation7 + $0x18] ss:$12 sps:$4 sm:$0xff]  }
  0x80   :  { %353 = vmatpush1.bf16.msra.mxu0 %v2064_v2  ;;  %v2068_v5 = vld [vmem:[#allocation7 + $0x34] ss:$12 sps:$4 sm:$0xff]   ;;  %v2070_v6 = vld [vmem:[#allocation7 + $0x30] ss:$12 sps:$4 sm:$0xff]   ;;  %v2071_v7 = vld [vmem:[#allocation7 + $0x4c] ss:$12 sps:$4 sm:$0xff]  }
  0x81   :  { %354 = vmatprep.subr.bf16.mxu0 %v2065_v3  ;;  %v2605_v8 = vld [vmem:[#allocation2] sm:$0xff]   ;;  %v2073_v9 = vld [vmem:[#allocation7 + $0x48] ss:$12 sps:$4 sm:$0xff]   ;;  %v2082_v15 = vld [vmem:[#allocation7 + $0x90] ss:$12 sps:$4 sm:$0xff]   ;;  %v2621_v22 = vshrl.u32 %v185_v21, 7 }
  0x82   :  { %v2074_v10 = vld [vmem:[#allocation7 + $0x64] ss:$12 sps:$4 sm:$0xff]   ;;  %v2076_v11 = vld [vmem:[#allocation7 + $0x60] ss:$12 sps:$4 sm:$0xff]   ;;  %1958 = vmatprep.mubr.bf16.mxu1 %v2605_v8  ;;  %v2077_v12 = vld [vmem:[#allocation7 + $0x7c] ss:$12 sps:$4 sm:$0xff]  }
  0x83   :  { %v2079_v13 = vld [vmem:[#allocation7 + $0x78] ss:$12 sps:$4 sm:$0xff]   ;;  %v2080_v14 = vld [vmem:[#allocation7 + $0x94] ss:$12 sps:$4 sm:$0xff]   ;;  %v187_v23 = vsub.s32 0, %v2621_v22  ;;  %v191_v25 = vsub.s32 1, %v2621_v22 }
  0x84   :  { %355 = vmatpush1.bf16.msra.mxu0 %v2067_v4  ;;  %v2083_v16 = vld [vmem:[#allocation7 + $0xac] ss:$12 sps:$4 sm:$0xff]   ;;  %v2085_v17 = vld [vmem:[#allocation7 + $0xa8] ss:$12 sps:$4 sm:$0xff]   ;;  %vm575_vm0 = vcmask 523264   ;;  %vm2447_vm1 = vmmov 0  }
  0x85   :  { %356 = vmatprep.subr.bf16.mxu0 %v2068_v5  ;;  %v2612_v19 = vld [vmem:[#allocation2 + $0x10] sm:$0xff]   ;;  %v2618_v20 = vld [vmem:[#allocation2 + $0x18] sm:$0xff]   ;;  %v2627_v24 = vld [vmem:[%s2933_s8] ss:$4 sm:$0x7]  ;;  %vm1632_vm2 = vcmask 1041409  }
  0x86   :  { %v188_v26 = vrot.slane %v2627_v24, %v187_v23  ;;  %v192_v28 = vrot.slane %v2627_v24, %v191_v25  ;;  %v2090_v5 = vld [vmem:[#allocation7 + $0x8] ss:$12 sps:$4 sm:$0xff]   ;;  %vm1635_vm3 = vcmask 1042434   ;;  %vm1638_vm4 = vcmask 1043459   ;;  %s2449_s28 = smov [#allocation14]  }
  0x87   :  { %1942 = vmatprep.subr.bf16.mxu1 %v2090_v5  ;;  %s1750_s3 = sshll.u32 %s2449_s28, 4  ;;  %s1751_s3 = int_to_ptr.vmem [resolvable:$true] %s1750_s3 }
  0x88   :  { %357 = vmatpush1.bf16.msra.mxu0 %v2070_v6  ;;  %v2091_v6 = vld [vmem:[#allocation7 + $0x20] ss:$12 sps:$4 sm:$0xff]   ;;  %1943 = vmatpush3.bf16.msra.mxu1 %v2090_v5  ;;  %s2400_s24 = scalar_lea.vmem %s1751_s3, 32  ;;  %p2405_p1 = scmp.lt.s32.totalorder %s1751_s3, %s1751_s3 }
  0x89   :  { %358 = vmatprep.subr.bf16.mxu0 %v2071_v7  ;;  %1944 = vmatprep.subr.bf16.mxu1 %v2091_v6  ;;  %v2092_v7 = vld [vmem:[#allocation7 + $0x38] ss:$12 sps:$4 sm:$0xff]   ;;  %p2401_p0 = scmp.ne.s32.totalorder %s1751_s3, %s2400_s24  ;;  %p2406_p2 = scmp.lt.s32.totalorder %s2400_s24, %s2400_s24 }
  0x8b   :  { %p2407_p3 = por %p2406_p2, %p2405_p1 }
  0x8c   :  { %359 = vmatpush1.bf16.msra.mxu0 %v2073_v9  ;;  %1945 = vmatpush3.bf16.msra.mxu1 %v2091_v6  ;;  %v2093_v9 = vld [vmem:[#allocation7 + $0x50] ss:$12 sps:$4 sm:$0xff]  }
  0x8d   :  { %360 = vmatprep.subr.bf16.mxu0 %v2074_v10  ;;  %1946 = vmatprep.subr.bf16.mxu1 %v2092_v7  ;;  %v2094_v10 = vld [vmem:[#allocation7 + $0x68] ss:$12 sps:$4 sm:$0xff]   ;;  %p2408_p4 = pnand %p2407_p3, %p2401_p0 }
  0x90   :  { %361 = vmatpush1.bf16.msra.mxu0 %v2076_v11  ;;  %1947 = vmatpush3.bf16.msra.mxu1 %v2092_v7  ;;  %v2095_v11 = vld [vmem:[#allocation7 + $0x80] ss:$12 sps:$4 sm:$0xff]  }
  0x91   :  { %362 = vmatprep.subr.bf16.mxu0 %v2077_v12  ;;  %1948 = vmatprep.subr.bf16.mxu1 %v2093_v9  ;;  %v2096_v12 = vld [vmem:[#allocation7 + $0x98] ss:$12 sps:$4 sm:$0xff]  }
  0x94   :  { %363 = vmatpush1.bf16.msra.mxu0 %v2079_v13  ;;  %1949 = vmatpush3.bf16.msra.mxu1 %v2093_v9  ;;  %v2097_v13 = vld [vmem:[#allocation7 + $0xb0] ss:$12 sps:$4 sm:$0xff]  }
  0x95   :  { %364 = vmatprep.subr.bf16.mxu0 %v2080_v14  ;;  %1950 = vmatprep.subr.bf16.mxu1 %v2094_v10  ;;  %v504_v14 = vld [vmem:[#allocation5 + $0x10] sm:$0xff] }
  0x98   :  { %365 = vmatpush1.bf16.msra.mxu0 %v2082_v15  ;;  %1951 = vmatpush3.bf16.msra.mxu1 %v2094_v10  ;;  %v502_v15 = vld [vmem:[#allocation5] sm:$0xff] }
  0x99   :  { %366 = vmatprep.subr.bf16.mxu0 %v2083_v16  ;;  %1952 = vmatprep.subr.bf16.mxu1 %v2095_v11 }
  0x9c   :  { %367 = vmatpush1.bf16.msra.mxu0 %v2085_v17  ;;  %1953 = vmatpush3.bf16.msra.mxu1 %v2095_v11  ;;  %v505_v17 = vld [vmem:[#allocation5 + $0x18] sm:$0xff] }
  0x9d   :  { %1954 = vmatprep.subr.bf16.mxu1 %v2096_v12 }
  0x9f   :  { %385 = vmatmul.mubr.bf16.vlgmr.msra.gmra.mrb[0].mxu0 %v2605_v8 }
  0xa0   :  { %394 = vmatprep.mubr.bf16.mxu0 %v2445_v0  ;;  %1955 = vmatpush3.bf16.msra.mxu1 %v2096_v12 }
  0xa1   :  { %1956 = vmatprep.subr.bf16.mxu1 %v2097_v13 }
  0xa4   :  { %1957 = vmatpush3.bf16.msra.mxu1 %v2097_v13 }
  0xa7   :  { %395 = vmatmul.mubr.bf16.gmra.mrb[4].mxu0 %v2608_v18  ;;  %1959 = vmatmul.mubr.bf16.vlgmr.msra.gmra.mrb[0].mxu1 %v2608_v18 }
  0xa8   :  { %404 = vmatprep.mubr.bf16.mxu0 %v2445_v0  ;;  %1962 = vmatprep.mubr.bf16.mxu1 %v2612_v19 }
  0xaf   :  { %405 = vmatmul.mubr.bf16.gmra.mrb[8].mxu0 %v2612_v19  ;;  %1963 = vmatmul.mubr.bf16.gmra.mrb[4].mxu1 %v2618_v20 }
  0xb0   :  { %414 = vmatprep.mubr.bf16.mxu0 %v2445_v0 }
  0xb7   :  { %415 = vmatmul.mubr.bf16.gmra.mrb[12].mxu0 %v2618_v20 }
 0x172   :  { %v386_v27 = vpop.f32.mrb[0].mxu0 }
 0x173   :  { %v388_v29 = vpop.f32.mrb[1].mxu0  ;;  %v387_v31 = vadd.f32 %v386_v27, %v188_v26  ;;  %v503_v27 = vld [vmem:[#allocation5 + $0x8] sm:$0xff] }
 0x174   :  { %v390_v30 = vpop.f32.mrb[2].mxu0  ;;  %v389_v34 = vadd.f32 %v388_v29, %v192_v28 }
 0x175   :  { %v391_v32 = vadd.f32 %v390_v30, %v188_v26  ;;  %v392_v33 = vpop.f32.mrb[3].mxu0 }
 0x176   :  { %v393_v35 = vadd.f32 %v392_v33, %v192_v28 }
 0x177   :  { %v490_v36 = vpack.c.bf16 %v391_v32, %v387_v31 }
 0x178   :  { %v494_v37 = vpack.c.bf16 %v393_v35, %v389_v34 }
 0x179   :  { %1974 = vmatprep.mubr.bf16.mxu0 %v490_v36  ;;  %v506_v36 = vld [vmem:[#allocation5 + $0x20] sm:$0xff] }
 0x17a   :  { %v396_v38 = vpop.f32.mrb[4].mxu0  ;;  %1966 = vmatprep.subr.bf16.mxu0 %v494_v37 }
 0x17b   :  { %v398_v39 = vpop.f32.mrb[5].mxu0  ;;  %1967 = vmatpush3.bf16.xpose.msra.mxu0 %v494_v37  ;;  %v397_v41 = vadd.f32 %v396_v38, %v188_v26 }
 0x17c   :  { %v400_v40 = vpop.f32.mrb[6].mxu0  ;;  %v399_v44 = vadd.f32 %v398_v39, %v192_v28  ;;  %v508_v39 = vld [vmem:[#allocation5 + $0x30] sm:$0xff] }
 0x17d   :  { %v401_v42 = vadd.f32 %v400_v40, %v188_v26  ;;  %v402_v43 = vpop.f32.mrb[7].mxu0 }
 0x17e   :  { %v403_v45 = vadd.f32 %v402_v43, %v192_v28 }
 0x17f   :  { %v491_v46 = vpack.c.bf16 %v401_v42, %v397_v41  ;;  %v507_v41 = vld [vmem:[#allocation5 + $0x28] sm:$0xff] }
 0x180   :  { %v495_v47 = vpack.c.bf16 %v403_v45, %v399_v44  ;;  %v509_v44 = vld [vmem:[#allocation5 + $0x38] sm:$0xff] }
 0x182   :  { %v406_v48 = vpop.f32.mrb[8].mxu0  ;;  %1968 = vmatprep.subr.bf16.mxu0 %v495_v47 }
 0x183   :  { %v408_v49 = vpop.f32.mrb[9].mxu0  ;;  %1969 = vmatpush3.bf16.xpose.msra.mxu0 %v495_v47  ;;  %v407_v51 = vadd.f32 %v406_v48, %v188_v26 }
 0x184   :  { %v410_v50 = vpop.f32.mrb[10].mxu0  ;;  %v409_v54 = vadd.f32 %v408_v49, %v192_v28 }
 0x185   :  { %v411_v52 = vadd.f32 %v410_v50, %v188_v26  ;;  %v412_v53 = vpop.f32.mrb[11].mxu0 }
 0x186   :  { %v413_v55 = vadd.f32 %v412_v53, %v192_v28  ;;  %v195_v53 = vsub.s32 2, %v2621_v22 }
 0x187   :  { %v492_v56 = vpack.c.bf16 %v411_v52, %v407_v51 }
 0x188   :  { %v496_v57 = vpack.c.bf16 %v413_v55, %v409_v54  ;;  %v2650_v54 = vrot.slane %v2627_v24, %v195_v53  ;;  %v1960_v55 = vpop.f32.mrb[0].mxu1 }
 0x18a   :  { %v416_v58 = vpop.f32.mrb[12].mxu0  ;;  %1970 = vmatprep.subr.bf16.mxu0 %v496_v57 }
 0x18b   :  { %v418_v59 = vpop.f32.mrb[13].mxu0  ;;  %1971 = vmatpush3.bf16.xpose.msra.mxu0 %v496_v57  ;;  %v417_v61 = vadd.f32 %v416_v58, %v188_v26  ;;  %v459_v57 = vpop.f32.mrb[1].mxu1 }
 0x18c   :  { %v420_v60 = vpop.f32.mrb[14].mxu0  ;;  %v419_v1 = vadd.f32 %v418_v59, %v192_v28  ;;  %v460_v58 = vadd.f32 %v459_v57, %v2650_v54  ;;  %v1961_v59 = vpop.f32.mrb[2].mxu1 }
 0x18d   :  { %v421_v62 = vadd.f32 %v420_v60, %v188_v26  ;;  %v422_v63 = vpop.f32.mrb[15].mxu0  ;;  %v471_v60 = vadd.f32 %v1961_v59, %v2650_v54 }
 0x18e   :  { %v423_v2 = vadd.f32 %v422_v63, %v192_v28 }
 0x18f   :  { %v493_v3 = vpack.c.bf16 %v421_v62, %v417_v61  ;;  %v462_v61 = vpop.f32.mrb[3].mxu1 }
 0x190   :  { %v497_v4 = vpack.c.bf16 %v423_v2, %v419_v1  ;;  %v463_v62 = vadd.f32 %v462_v61, %v2650_v54  ;;  %v1964_v2 = vpop.f32.mrb[4].mxu1 }
 0x192   :  { %1972 = vmatprep.subr.bf16.mxu0 %v497_v4  ;;  %v498_v1 = vpack.c.bf16 %v463_v62, %v460_v58 }
 0x193   :  { %1973 = vmatpush3.bf16.xpose.msra.mxu0 %v497_v4 }
 0x194   :  { %1982 = vmatprep.subr.bf16.mxu1 %v498_v1 }
 0x195   :  { %1983 = vmatpush3.bf16.msra.mxu1 %v498_v1 }
 0x19a   :  { %1975 = vmatmul.mubr.bf16.vlgmr.msra.gmra.mrb[16].mxu0 %v491_v46 }
 0x19b   :  { %1978 = vmatprep.mubr.bf16.mxu0 %v492_v56  ;;  %v468_v56 = vadd.f32 %v1960_v55, %v2650_v54 }
 0x19d   :  { %v499_v63 = vpack.c.bf16 %v471_v60, %v468_v56  ;;  %v2098_v60 = vld [vmem:[#allocation8] sm:$0xff]  }
 0x19f   :  { %1984 = vmatprep.subr.bf16.mxu1 %v499_v63 }
 0x1a0   :  { %1985 = vmatpush3.bf16.msra.mxu1 %v499_v63 }
 0x1a2   :  { %1979 = vmatmul.mubr.bf16.gmra.mrb[20].mxu0 %v493_v3 }
 0x1a3   :  { %1148 = vmatprep.mubr.bf16.mxu0 %v2445_v0 }
 0x26d   :  { %v1976_v16 = vpop.f32.mrb[16].mxu0 }
 0x26e   :  { %v553_v21 = vadd.f32 %v1976_v16, %v504_v14  ;;  %v544_v26 = vpop.f32.mrb[17].mxu0 }
 0x26f   :  { %v545_v28 = vadd.f32 %v544_v26, %v502_v15  ;;  %v1977_v29 = vpop.f32.mrb[18].mxu0 }
 0x270   :  { %v556_v30 = vadd.f32 %v1977_v29, %v505_v17  ;;  %v547_v31 = vpop.f32.mrb[19].mxu0  ;;  %v582_v32 = vsel %vm575_vm0, %v553_v21, -inf }
 0x271   :  { %v548_v33 = vadd.f32 %v547_v31, %v503_v27  ;;  %583 = vmax.xlane.f32.xlu1 %v582_v32  ;;  %v576_v34 = vsel %vm575_vm0, %v545_v28, -inf }
 0x272   :  { %577 = vmax.xlane.f32.xlu0 %v576_v34  ;;  %v585_v35 = vsel %vm575_vm0, %v556_v30, -inf }
 0x273   :  { %v579_v38 = vsel %vm575_vm0, %v548_v33, -inf }
 0x275   :  { %586 = vmax.xlane.f32.xlu1 %v585_v35  ;;  %v1980_v37 = vpop.f32.mrb[20].mxu0 }
 0x276   :  { %v560_v40 = vpop.f32.mrb[21].mxu0  ;;  %580 = vmax.xlane.f32.xlu0 %v579_v38  ;;  %v569_v46 = vadd.f32 %v1980_v37, %v508_v39 }
 0x277   :  { %v561_v42 = vadd.f32 %v560_v40, %v506_v36  ;;  %v1981_v43 = vpop.f32.mrb[22].mxu0 }
 0x278   :  { %v563_v45 = vpop.f32.mrb[23].mxu0  ;;  %v572_v49 = vadd.f32 %v1981_v43, %v509_v44  ;;  %v594_v51 = vsel %vm575_vm0, %v569_v46, -inf }
 0x279   :  { %v564_v47 = vadd.f32 %v563_v45, %v507_v41  ;;  %v588_v48 = vsel %vm575_vm0, %v561_v42, -inf }
 0x27a   :  { %589 = vmax.xlane.f32.xlu0 %v588_v48  ;;  %v597_v52 = vsel %vm575_vm0, %v572_v49, -inf }
 0x27b   :  { %v591_v50 = vsel %vm575_vm0, %v564_v47, -inf }
 0x27c   :  { %592 = vmax.xlane.f32.xlu1 %v591_v50  ;;  %v475_v50 = vpop.f32.mrb[5].mxu1 }
 0x27d   :  { %v1965_v53 = vpop.f32.mrb[6].mxu1 }
 0x27e   :  { %595 = vmax.xlane.f32.xlu0 %v594_v51  ;;  %v487_v55 = vadd.f32 %v1965_v53, %v2650_v54  ;;  %v478_v56 = vpop.f32.mrb[7].mxu1  ;;  %v137_v53 = vunpack.c.l.bf16 %v2605_v8 }
 0x27f   :  { %v479_v57 = vadd.f32 %v478_v56, %v2650_v54 }
 0x280   :  { %598 = vmax.xlane.f32.xlu1 %v597_v52  ;;  %v476_v52 = vadd.f32 %v475_v50, %v2650_v54 }
 0x282   :  { %v500_v59 = vpack.c.bf16 %v479_v57, %v476_v52 }
 0x284   :  { %1986 = vmatprep.subr.bf16.mxu1 %v500_v59 }
 0x285   :  { %1987 = vmatpush3.bf16.msra.mxu1 %v500_v59 }
 0x2fe   :  { %v584_v3 = vpop.xlane.xlu1 %583 }
 0x2ff   :  { %v602_v24 = vsub.f32 %v553_v21, %v584_v3  ;;  %v578_v4 = vpop.xlane.xlu0 %577 }
 0x300   :  { %v600_v5 = vsub.f32 %v545_v28, %v578_v4 }
 0x301   :  { %v612_v6 = vmul.f32 1.442695, %v602_v24 }
 0x302   :  { %v608_v7 = vmul.f32 1.442695, %v600_v5  ;;  %v587_v9 = vpop.xlane.xlu1 %586 }
 0x303   :  { %v603_v10 = vsub.f32 %v556_v30, %v587_v9  ;;  %v581_v11 = vpop.xlane.xlu0 %580 }
 0x304   :  { %2158 = vpow2.f32 %v608_v7  ;;  %v601_v12 = vsub.f32 %v548_v33, %v581_v11 }
 0x305   :  { %2160 = vpow2.f32 %v612_v6  ;;  %v614_v13 = vmul.f32 1.442695, %v603_v10 }
 0x306   :  { %v610_v14 = vmul.f32 1.442695, %v601_v12 }
 0x307   :  { %v590_v15 = vpop.xlane.xlu0 %589 }
 0x308   :  { %2162 = vpow2.f32 %v610_v14  ;;  %v604_v16 = vsub.f32 %v561_v42, %v590_v15 }
 0x309   :  { %v593_v17 = vpop.xlane.xlu1 %592  ;;  %2164 = vpow2.f32 %v614_v13 }
 0x30a   :  { %v616_v21 = vmul.f32 1.442695, %v604_v16  ;;  %v605_v26 = vsub.f32 %v564_v47, %v593_v17  ;;  %v2099_v16 = vld [vmem:[#allocation8 + $0x8] sm:$0xff]  }
 0x30b   :  { %v596_v27 = vpop.xlane.xlu0 %595 }
 0x30c   :  { %2166 = vpow2.f32 %v616_v21  ;;  %v618_v28 = vmul.f32 1.442695, %v605_v26  ;;  %v606_v29 = vsub.f32 %v569_v46, %v596_v27 }
 0x30d   :  { %v599_v31 = vpop.xlane.xlu1 %598 }
 0x30e   :  { %v2159_v32 = vpop.eup %2158  ;;  %2168 = vpow2.f32 %v618_v28  ;;  %v620_v30 = vmul.f32 1.442695, %v606_v29  ;;  %v607_v34 = vsub.f32 %v572_v49, %v599_v31  ;;  %v484_v49 = vadd.f32 %v1964_v2, %v2650_v54  ;;  %v2100_v29 = vld [vmem:[#allocation8 + $0x10] sm:$0xff]  }
 0x30f   :  { %v624_v33 = vsel %vm575_vm0, %v2159_v32, 0.0  ;;  %v2657_v35 = vpop.eup %2160 }
 0x310   :  { %2170 = vpow2.f32 %v620_v30  ;;  %v622_v36 = vmul.f32 1.442695, %v607_v34  ;;  %625 = vadd.xlane.f32.xlu0 %v624_v33  ;;  %v630_v38 = vsel %vm575_vm0, %v2657_v35, 0.0  ;;  %v501_v58 = vpack.c.bf16 %v487_v55, %v484_v49  ;;  %v2101_v33 = vld [vmem:[#allocation8 + $0x18] sm:$0xff]  }
 0x312   :  { %v2163_v37 = vpop.eup %2162  ;;  %2172 = vpow2.f32 %v622_v36  ;;  %1988 = vmatprep.subr.bf16.mxu1 %v501_v58  ;;  %v2103_v36 = vld [vmem:[#allocation8 + $0x28] sm:$0xff]  }
 0x313   :  { %v627_v39 = vsel %vm575_vm0, %v2163_v37, 0.0  ;;  %v2165_v40 = vpop.eup %2164  ;;  %1989 = vmatpush3.bf16.msra.mxu1 %v501_v58  ;;  %v138_v58 = vunpack.c.h.bf16 %v2605_v8 }
 0x314   :  { %631 = vadd.xlane.f32.xlu0 %v630_v38  ;;  %628 = vadd.xlane.f32.xlu1 %v627_v39  ;;  %v633_v42 = vsel %vm575_vm0, %v2165_v40, 0.0  ;;  %v2105_v38 = vld [vmem:[#allocation8 + $0x38] sm:$0xff]  }
 0x315   :  { %1998 = vmatprep.subr.bf16.mxu1 %v2098_v60 }
 0x316   :  { %v2167_v41 = vpop.eup %2166 }
 0x317   :  { %v636_v43 = vsel %vm575_vm0, %v2167_v41, 0.0 }
 0x318   :  { %v2169_v44 = vpop.eup %2168  ;;  %634 = vadd.xlane.f32.xlu1 %v633_v42  ;;  %637 = vadd.xlane.f32.xlu0 %v636_v43 }
 0x319   :  { %v639_v46 = vsel %vm575_vm0, %v2169_v44, 0.0 }
 0x31a   :  { %v2664_v45 = vpop.eup %2170 }
 0x31b   :  { %v642_v47 = vsel %vm575_vm0, %v2664_v45, 0.0 }
 0x31c   :  { %v2173_v48 = vpop.eup %2172  ;;  %640 = vadd.xlane.f32.xlu1 %v639_v46  ;;  %643 = vadd.xlane.f32.xlu0 %v642_v47 }
 0x31d   :  { %v645_v51 = vsel %vm575_vm0, %v2173_v48, 0.0 }
 0x320   :  { %646 = vadd.xlane.f32.xlu1 %v645_v51  ;;  %v1797_v51 = vld [vmem:[%s2932_s7] ss:$0 sm:$0xff] }
 0x39d   :  { %v626_v61 = vpop.xlane.xlu0 %625 }
 0x39e   :  { %2174 = vrcp.f32 %v626_v61 }
 0x3a1   :  { %v629_v62 = vpop.xlane.xlu1 %628  ;;  %v632_v63 = vpop.xlane.xlu0 %631 }
 0x3a2   :  { %2176 = vrcp.f32 %v629_v62 }
 0x3a3   :  { %2178 = vrcp.f32 %v632_v63  ;;  %v139_v63 = vunpack.c.l.bf16 %v2608_v18 }
 0x3a5   :  { %v635_v1 = vpop.xlane.xlu1 %634  ;;  %v638_v2 = vpop.xlane.xlu0 %637 }
 0x3a6   :  { %2180 = vrcp.f32 %v635_v1 }
 0x3a7   :  { %2182 = vrcp.f32 %v638_v2 }
 0x3a8   :  { %v2175_v24 = vpop.eup %2174 }
 0x3a9   :  { %v641_v3 = vpop.xlane.xlu1 %640  ;;  %v644_v54 = vpop.xlane.xlu0 %643  ;;  %v656_v6 = vmul.f32 %v2175_v24, %v2159_v32 }
 0x3aa   :  { %2184 = vrcp.f32 %v641_v3  ;;  %v140_v3 = vunpack.c.h.bf16 %v2608_v18 }
 0x3ab   :  { %2186 = vrcp.f32 %v644_v54 }
 0x3ac   :  { %v2177_v4 = vpop.eup %2176 }
 0x3ad   :  { %v647_v5 = vpop.xlane.xlu1 %646  ;;  %v657_v7 = vmul.f32 %v2177_v4, %v2163_v37  ;;  %v2179_v9 = vpop.eup %2178  ;;  %v2104_v37 = vld [vmem:[#allocation8 + $0x30] sm:$0xff]   ;;  %v141_v4 = vunpack.c.l.bf16 %v2612_v19 }
 0x3ae   :  { %2188 = vrcp.f32 %v647_v5  ;;  %v658_v12 = vmul.f32 %v2179_v9, %v2657_v35  ;;  %v2102_v35 = vld [vmem:[#allocation8 + $0x20] sm:$0xff]   ;;  %v142_v9 = vunpack.c.h.bf16 %v2612_v19  ;;  %v2111_v19 = vld [vmem:[#allocation10 + $0x14] ss:$8 sps:$4 sm:$0xff]  }
 0x3af   :  { %v664_v10 = vpack.c.bf16 %v657_v7, %v656_v6 }
 0x3b0   :  { %v2181_v11 = vpop.eup %2180 }
 0x3b1   :  { %v659_v13 = vmul.f32 %v2181_v11, %v2165_v40  ;;  %1990 = vmatprep.mubr.msk.bf16.mxu1 %vm575_vm0, %v664_v10  ;;  %v2183_v14 = vpop.eup %2182 }
 0x3b2   :  { %v660_v21 = vmul.f32 %v2183_v14, %v2167_v41  ;;  %v143_v14 = vunpack.c.l.bf16 %v2618_v20 }
 0x3b3   :  { %v665_v15 = vpack.c.bf16 %v659_v13, %v658_v12 }
 0x3b4   :  { %v2185_v17 = vpop.eup %2184 }
 0x3b5   :  { %1991 = vmatmul.mubr.msk.bf16.vlgmr.msra.gmra.mrb[8].mxu1 %vm575_vm0, %v665_v15  ;;  %v661_v26 = vmul.f32 %v2185_v17, %v2169_v44  ;;  %v2187_v27 = vpop.eup %2186 }
 0x3b6   :  { %1999 = vmatpush3.bf16.msra.mxu1 %v2098_v60  ;;  %v662_v32 = vmul.f32 %v2187_v27, %v2664_v45  ;;  %v2108_v27 = vld [vmem:[#allocation10 + $0x4] ss:$8 sps:$4 sm:$0xff]  }
 0x3b7   :  { %v666_v28 = vpack.c.bf16 %v661_v26, %v660_v21  ;;  %2000 = vmatprep.subr.bf16.mxu1 %v2099_v16  ;;  %v2106_v26 = vld [vmem:[#allocation10] ss:$8 sps:$4 sm:$0xff]   ;;  %1116 = vmatprep.subr.bf16.mxu0 %v2108_v27 }
 0x3b8   :  { %v2189_v31 = vpop.eup %2188  ;;  %1117 = vmatpush1.bf16.msra.mxu0 %v2106_v26 }
 0x3b9   :  { %1994 = vmatprep.mubr.msk.bf16.mxu1 %vm575_vm0, %v666_v28  ;;  %v663_v30 = vmul.f32 %v2189_v31, %v2173_v48  ;;  %v2109_v28 = vld [vmem:[#allocation10 + $0x10] ss:$8 sps:$4 sm:$0xff]   ;;  %1118 = vmatprep.subr.bf16.mxu0 %v2111_v19 }
 0x3ba   :  { %2001 = vmatpush3.bf16.msra.mxu1 %v2099_v16  ;;  %v144_v16 = vunpack.c.h.bf16 %v2618_v20 }
 0x3bb   :  { %v667_v34 = vpack.c.bf16 %v663_v30, %v662_v32  ;;  %2002 = vmatprep.subr.bf16.mxu1 %v2100_v29 }
 0x3bc   :  { %1119 = vmatpush1.bf16.msra.mxu0 %v2109_v28 }
 0x3bd   :  { %1995 = vmatmul.mubr.msk.bf16.gmra.mrb[12].mxu1 %vm575_vm0, %v667_v34 }
 0x3be   :  { %2003 = vmatpush3.bf16.msra.mxu1 %v2100_v29 }
 0x3bf   :  { %2004 = vmatprep.subr.bf16.mxu1 %v2101_v33 }
 0x3c2   :  { %2005 = vmatpush3.bf16.msra.mxu1 %v2101_v33 }
 0x3c3   :  { %2006 = vmatprep.subr.bf16.mxu1 %v2102_v35 }
 0x3c6   :  { %2007 = vmatpush3.bf16.msra.mxu1 %v2102_v35 }
 0x3c7   :  { %2008 = vmatprep.subr.bf16.mxu1 %v2103_v36 }
 0x3ca   :  { %2009 = vmatpush3.bf16.msra.mxu1 %v2103_v36 }
 0x3cb   :  { %2010 = vmatprep.subr.bf16.mxu1 %v2104_v37 }
 0x3ce   :  { %2011 = vmatpush3.bf16.msra.mxu1 %v2104_v37 }
 0x3cf   :  { %2012 = vmatprep.subr.bf16.mxu1 %v2105_v38 }
 0x3d2   :  { %2013 = vmatpush3.bf16.msra.mxu1 %v2105_v38 }
 0x488   :  { %v1992_v39 = vpop.f32.mrb[8].mxu1 }
 0x489   :  { %v714_v40 = vpop.f32.mrb[9].mxu1 }
 0x48a   :  { %v1993_v41 = vpop.f32.mrb[10].mxu1 }
 0x48b   :  { %v746_v42 = vpack.c.bf16 %v1993_v41, %v1992_v39  ;;  %v717_v43 = vpop.f32.mrb[11].mxu1 }
 0x48c   :  { %v745_v44 = vpack.c.bf16 %v717_v43, %v714_v40 }
 0x48e   :  { %2014 = vmatprep.mubr.bf16.mxu1 %v745_v44 }
 0x48f   :  { %2015 = vmatmul.mubr.bf16.vlgmr.msra.gmra.mrb[16].mxu1 %v746_v42 }
 0x490   :  { %v1996_v45 = vpop.f32.mrb[12].mxu1 }
 0x491   :  { %v730_v46 = vpop.f32.mrb[13].mxu1 }
 0x492   :  { %v1997_v47 = vpop.f32.mrb[14].mxu1 }
 0x493   :  { %v748_v48 = vpack.c.bf16 %v1997_v47, %v1996_v45  ;;  %v733_v49 = vpop.f32.mrb[15].mxu1 }
 0x494   :  { %v747_v50 = vpack.c.bf16 %v733_v49, %v730_v46 }
 0x496   :  { %2018 = vmatprep.mubr.bf16.mxu1 %v747_v50 }
 0x497   :  { %2019 = vmatmul.mubr.bf16.gmra.mrb[20].mxu1 %v748_v48 }
 0x562   :  { %v2016_v52 = vpop.f32.mrb[16].mxu1 }
 0x563   :  { %v851_v55 = vpop.f32.mrb[17].mxu1  ;;  %v860_v60 = vadd.f32 %v2016_v52, %v1797_v51 }
 0x564   :  { %v852_v56 = vadd.f32 %v1797_v51, %v851_v55  ;;  %v2017_v57 = vpop.f32.mrb[18].mxu1 }
 0x565   :  { %v854_v59 = vpop.f32.mrb[19].mxu1  ;;  %v863_v1 = vadd.f32 %v2017_v57, %v1797_v51  ;;  %v884_v24 = vadd.f32 %v860_v60, %v139_v63  ;;  %v2117_v63 = vld [vmem:[#allocation10 + $0x34] ss:$8 sps:$4 sm:$0xff]  }
 0x566   :  { %v855_v61 = vadd.f32 %v1797_v51, %v854_v59  ;;  %v882_v62 = vadd.f32 %v852_v56, %v137_v53 }
 0x567   :  { %v885_v8 = vadd.f32 %v863_v1, %v140_v3  ;;  %v2115_v1 = vld [vmem:[#allocation10 + $0x30] ss:$8 sps:$4 sm:$0xff]   ;;  %v2118_v3 = vld [vmem:[#allocation10 + $0x40] ss:$8 sps:$4 sm:$0xff]  }
 0x568   :  { %890 = vadd.xlane.f32.xlu0 %v882_v62  ;;  %v883_v2 = vadd.f32 %v855_v61, %v138_v58  ;;  %v2114_v61 = vld [vmem:[#allocation10 + $0x24] ss:$8 sps:$4 sm:$0xff]  }
 0x569   :  { %1120 = vmatprep.subr.bf16.mxu0 %v2114_v61 }
 0x56a   :  { %892 = vadd.xlane.f32.xlu1 %v883_v2  ;;  %v2020_v54 = vpop.f32.mrb[20].mxu1 }
 0x56b   :  { %v867_v5 = vpop.f32.mrb[21].mxu1  ;;  %v876_v11 = vadd.f32 %v2020_v54, %v1797_v51  ;;  %v2123_v54 = vld [vmem:[#allocation10 + $0x54] ss:$8 sps:$4 sm:$0xff]  }
 0x56c   :  { %v868_v6 = vadd.f32 %v1797_v51, %v867_v5  ;;  %v2021_v7 = vpop.f32.mrb[22].mxu1  ;;  %894 = vadd.xlane.f32.xlu0 %v884_v24  ;;  %v2124_v5 = vld [vmem:[#allocation10 + $0x60] ss:$8 sps:$4 sm:$0xff]  }
 0x56d   :  { %v870_v10 = vpop.f32.mrb[23].mxu1  ;;  %v879_v18 = vadd.f32 %v2021_v7, %v1797_v51  ;;  %v888_v17 = vadd.f32 %v876_v11, %v143_v14  ;;  %v2129_v7 = vld [vmem:[#allocation10 + $0x74] ss:$8 sps:$4 sm:$0xff]  }
 0x56e   :  { %v871_v12 = vadd.f32 %v1797_v51, %v870_v10  ;;  %896 = vadd.xlane.f32.xlu1 %v885_v8  ;;  %v886_v13 = vadd.f32 %v868_v6, %v141_v4  ;;  %v2126_v4 = vld [vmem:[#allocation10 + $0x64] ss:$8 sps:$4 sm:$0xff]   ;;  %v2127_v6 = vld [vmem:[#allocation10 + $0x70] ss:$8 sps:$4 sm:$0xff]  }
 0x56f   :  { %v889_v21 = vadd.f32 %v879_v18, %v144_v16 }
 0x570   :  { %898 = vadd.xlane.f32.xlu0 %v886_v13  ;;  %v887_v15 = vadd.f32 %v871_v12, %v142_v9 }
 0x572   :  { %900 = vadd.xlane.f32.xlu1 %v887_v15 }
 0x574   :  { %902 = vadd.xlane.f32.xlu0 %v888_v17 }
 0x576   :  { %904 = vadd.xlane.f32.xlu1 %v889_v21 }
 0x5f5   :  { %v891_v29 = vpop.xlane.xlu0 %890 }
 0x5f6   :  { %v907_v31 = vmul.f32 0.0078125, %v891_v29 }
 0x5f7   :  { %v893_v32 = vpop.xlane.xlu1 %892 }
 0x5f8   :  { %v2691_v30 = vsub.f32 %v882_v62, %v907_v31  ;;  %v908_v34 = vmul.f32 0.0078125, %v893_v32  ;;  %v2112_v62 = vld [vmem:[#allocation10 + $0x20] ss:$8 sps:$4 sm:$0xff]  }
 0x5f9   :  { %v895_v20 = vpop.xlane.xlu0 %894  ;;  %1121 = vmatpush1.bf16.msra.mxu0 %v2112_v62 }
 0x5fa   :  { %v2693_v33 = vsub.f32 %v883_v2, %v908_v34  ;;  %v909_v35 = vmul.f32 0.0078125, %v895_v20  ;;  %v923_v36 = vmul.f32 %v2691_v30, %v2691_v30  ;;  %1122 = vmatprep.subr.bf16.mxu0 %v2117_v63  ;;  %v2120_v2 = vld [vmem:[#allocation10 + $0x44] ss:$8 sps:$4 sm:$0xff]  }
 0x5fb   :  { %v897_v37 = vpop.xlane.xlu1 %896 }
 0x5fc   :  { %v2697_v38 = vsub.f32 %v884_v24, %v909_v35  ;;  %v910_v39 = vmul.f32 0.0078125, %v897_v37  ;;  %931 = vadd.xlane.f32.xlu0 %v923_v36  ;;  %v924_v40 = vmul.f32 %v2693_v33, %v2693_v33  ;;  %v2121_v24 = vld [vmem:[#allocation10 + $0x50] ss:$8 sps:$4 sm:$0xff]   ;;  %v1806_v35 = vld [vmem:[%s2932_s7 + $0x1] ss:$0 sm:$0xff] }
 0x5fd   :  { %v899_v41 = vpop.xlane.xlu0 %898  ;;  %1123 = vmatpush1.bf16.msra.mxu0 %v2115_v1 }
 0x5fe   :  { %v2701_v42 = vsub.f32 %v885_v8, %v910_v39  ;;  %v911_v43 = vmul.f32 0.0078125, %v899_v41  ;;  %933 = vadd.xlane.f32.xlu1 %v924_v40  ;;  %v925_v44 = vmul.f32 %v2697_v38, %v2697_v38  ;;  %1124 = vmatprep.subr.bf16.mxu0 %v2120_v2 }
 0x5ff   :  { %v901_v45 = vpop.xlane.xlu1 %900 }
 0x600   :  { %v2705_v46 = vsub.f32 %v886_v13, %v911_v43  ;;  %v912_v47 = vmul.f32 0.0078125, %v901_v45  ;;  %935 = vadd.xlane.f32.xlu0 %v925_v44  ;;  %v926_v48 = vmul.f32 %v2701_v42, %v2701_v42 }
 0x601   :  { %v903_v49 = vpop.xlane.xlu0 %902  ;;  %1125 = vmatpush1.bf16.msra.mxu0 %v2118_v3 }
 0x602   :  { %v2709_v50 = vsub.f32 %v887_v15, %v912_v47  ;;  %v913_v51 = vmul.f32 0.0078125, %v903_v49  ;;  %937 = vadd.xlane.f32.xlu1 %v926_v48  ;;  %v927_v52 = vmul.f32 %v2705_v46, %v2705_v46  ;;  %1126 = vmatprep.subr.bf16.mxu0 %v2123_v54  ;;  %v1807_v47 = vld [vmem:[%s2932_s7 + $0x2] ss:$0 sm:$0xff] }
 0x603   :  { %v905_v53 = vpop.xlane.xlu1 %904 }
 0x604   :  { %v2713_v55 = vsub.f32 %v888_v17, %v913_v51  ;;  %v914_v56 = vmul.f32 0.0078125, %v905_v53  ;;  %939 = vadd.xlane.f32.xlu0 %v927_v52  ;;  %v928_v57 = vmul.f32 %v2709_v50, %v2709_v50 }
 0x605   :  { %1127 = vmatpush1.bf16.msra.mxu0 %v2121_v24 }
 0x606   :  { %v2717_v58 = vsub.f32 %v889_v21, %v914_v56  ;;  %941 = vadd.xlane.f32.xlu1 %v928_v57  ;;  %v929_v59 = vmul.f32 %v2713_v55, %v2713_v55  ;;  %1128 = vmatprep.subr.bf16.mxu0 %v2126_v4 }
 0x608   :  { %943 = vadd.xlane.f32.xlu0 %v929_v59  ;;  %v930_v60 = vmul.f32 %v2717_v58, %v2717_v58 }
 0x609   :  { %1129 = vmatpush1.bf16.msra.mxu0 %v2124_v5 }
 0x60a   :  { %945 = vadd.xlane.f32.xlu1 %v930_v60  ;;  %1130 = vmatprep.subr.bf16.mxu0 %v2129_v7 }
 0x60d   :  { %1131 = vmatpush1.bf16.msra.mxu0 %v2127_v6 }
 0x689   :  { %v932_v8 = vpop.xlane.xlu0 %931 }
 0x68a   :  { %v947_v9 = vmul.f32 0.0078125, %v932_v8 }
 0x68b   :  { %v934_v10 = vpop.xlane.xlu1 %933 }
 0x68c   :  { %v955_v11 = vadd.f32 1e-12, %v947_v9  ;;  %v948_v12 = vmul.f32 0.0078125, %v934_v10 }
 0x68d   :  { %v936_v13 = vpop.xlane.xlu0 %935 }
 0x68e   :  { %2190 = vrsqrt.f32 %v955_v11  ;;  %v956_v14 = vadd.f32 1e-12, %v948_v12  ;;  %v949_v18 = vmul.f32 0.0078125, %v936_v13  ;;  %v2130_v12 = vld [vmem:[#allocation11 + $0x40] sm:$0xff]  }
 0x68f   :  { %v938_v15 = vpop.xlane.xlu1 %937  ;;  %v2131_v13 = vld [vmem:[#allocation11] sm:$0xff]   ;;  %1893 = vmatprep.subr.bf16.mxu1 %v2130_v12 }
 0x690   :  { %2192 = vrsqrt.f32 %v956_v14  ;;  %v957_v16 = vadd.f32 1e-12, %v949_v18  ;;  %v950_v17 = vmul.f32 0.0078125, %v938_v15  ;;  %1894 = vmatpush3.bf16.msra.mxu1 %v2131_v13  ;;  %v2133_v14 = vld [vmem:[#allocation11 + $0x8] sm:$0xff]   ;;  %v2135_v18 = vld [vmem:[#allocation11 + $0x10] sm:$0xff]   ;;  %v2136_v15 = vld [vmem:[#allocation11 + $0x58] sm:$0xff]  }
 0x691   :  { %v940_v21 = vpop.xlane.xlu0 %939 }
 0x692   :  { %2194 = vrsqrt.f32 %v957_v16  ;;  %v958_v26 = vadd.f32 1e-12, %v950_v17  ;;  %v951_v27 = vmul.f32 0.0078125, %v940_v21  ;;  %v2138_v16 = vld [vmem:[#allocation11 + $0x60] sm:$0xff]   ;;  %v2140_v21 = vld [vmem:[#allocation11 + $0x68] sm:$0xff]  }
 0x693   :  { %v942_v19 = vpop.xlane.xlu1 %941  ;;  %v2139_v17 = vld [vmem:[#allocation11 + $0x20] sm:$0xff]  }
 0x694   :  { %2196 = vrsqrt.f32 %v958_v26  ;;  %v952_v28 = vmul.f32 0.0078125, %v942_v19  ;;  %v959_v29 = vadd.f32 1e-12, %v951_v27  ;;  %v2141_v26 = vld [vmem:[#allocation11 + $0x28] sm:$0xff]   ;;  %v2142_v27 = vld [vmem:[#allocation11 + $0x70] sm:$0xff]  }
 0x695   :  { %v944_v32 = vpop.xlane.xlu0 %943  ;;  %v2143_v19 = vld [vmem:[#allocation11 + $0x30] sm:$0xff]  }
 0x696   :  { %v960_v31 = vadd.f32 1e-12, %v952_v28  ;;  %v953_v40 = vmul.f32 0.0078125, %v944_v32  ;;  %v2144_v28 = vld [vmem:[#allocation11 + $0x78] sm:$0xff]  }
 0x697   :  { %v946_v34 = vpop.xlane.xlu1 %945 }
 0x698   :  { %v2191_v20 = vpop.eup %2190  ;;  %2198 = vrsqrt.f32 %v960_v31  ;;  %v954_v36 = vmul.f32 0.0078125, %v946_v34  ;;  %v961_v51 = vadd.f32 1e-12, %v953_v40  ;;  %v1808_v31 = vld [vmem:[%s2933_s8 + $0x1] ss:$4 sm:$0x3] }
 0x699   :  { %v971_v37 = vmul.f32 %v2191_v20, %v2691_v30  ;;  %2200 = vrsqrt.f32 %v959_v29  ;;  %v2145_v29 = vld [vmem:[#allocation11 + $0x38] sm:$0xff]   ;;  %v2757_v32 = vrot.slane %v1808_v31, %v187_v23  ;;  %v2761_v34 = vrot.slane %v1808_v31, %v191_v25 }
 0x69a   :  { %v2193_v39 = vpop.eup %2192  ;;  %v962_v45 = vadd.f32 1e-12, %v954_v36 }
 0x69b   :  { %v983_v41 = vmul.f32 %v1806_v35, %v971_v37  ;;  %v972_v43 = vmul.f32 %v2193_v39, %v2693_v33 }
 0x69c   :  { %v2195_v44 = vpop.eup %2194  ;;  %2202 = vrsqrt.f32 %v962_v45 }
 0x69d   :  { %v984_v48 = vmul.f32 %v1806_v35, %v972_v43  ;;  %v2731_v52 = vadd.f32 %v1807_v47, %v983_v41  ;;  %v973_v30 = vmul.f32 %v2195_v44, %v2697_v38  ;;  %2204 = vrsqrt.f32 %v961_v51 }
 0x69e   :  { %v2197_v49 = vpop.eup %2196 }
 0x69f   :  { %v996_v53 = vadd.f32 %v1807_v47, %v984_v48  ;;  %v974_v56 = vmul.f32 %v2197_v49, %v2701_v42  ;;  %v985_v60 = vmul.f32 %v1806_v35, %v973_v30 }
 0x6a1   :  { %v1003_v57 = vpack.c.bf16 %v996_v53, %v2731_v52  ;;  %v986_v33 = vmul.f32 %v1806_v35, %v974_v56  ;;  %v2738_v1 = vadd.f32 %v1807_v47, %v985_v60 }
 0x6a2   :  { %v2199_v59 = vpop.eup %2198 }
 0x6a3   :  { %1149 = vmatmul.mubr.bf16.vlgmr.msra.gmra.mrb[24].mxu0 %v1003_v57  ;;  %v2201_v61 = vpop.eup %2200  ;;  %v998_v62 = vadd.f32 %v1807_v47, %v986_v33  ;;  %v976_v63 = vmul.f32 %v2199_v59, %v2709_v50 }
 0x6a4   :  { %1158 = vmatprep.mubr.bf16.mxu0 %v2445_v0  ;;  %v975_v38 = vmul.f32 %v2201_v61, %v2705_v46 }
 0x6a5   :  { %v1004_v42 = vpack.c.bf16 %v998_v62, %v2738_v1  ;;  %v988_v2 = vmul.f32 %v1806_v35, %v976_v63 }
 0x6a6   :  { %v2203_v3 = vpop.eup %2202  ;;  %v987_v54 = vmul.f32 %v1806_v35, %v975_v38 }
 0x6a7   :  { %v2205_v24 = vpop.eup %2204  ;;  %v1000_v4 = vadd.f32 %v1807_v47, %v988_v2  ;;  %v978_v5 = vmul.f32 %v2203_v3, %v2717_v58  ;;  %v2132_v58 = vld [vmem:[#allocation11 + $0x48] sm:$0xff]  }
 0x6a8   :  { %v2744_v6 = vadd.f32 %v1807_v47, %v987_v54  ;;  %v977_v50 = vmul.f32 %v2205_v24, %v2713_v55  ;;  %1895 = vmatprep.subr.bf16.mxu1 %v2132_v58  ;;  %v2134_v55 = vld [vmem:[#allocation11 + $0x50] sm:$0xff]  }
 0x6a9   :  { %v990_v8 = vmul.f32 %v1806_v35, %v978_v5  ;;  %1896 = vmatpush3.bf16.msra.mxu1 %v2133_v14 }
 0x6aa   :  { %v1005_v7 = vpack.c.bf16 %v1000_v4, %v2744_v6  ;;  %v989_v46 = vmul.f32 %v1806_v35, %v977_v50  ;;  %1897 = vmatprep.subr.bf16.mxu1 %v2134_v55 }
 0x6ab   :  { %1159 = vmatmul.mubr.bf16.gmra.mrb[28].mxu0 %v1004_v42  ;;  %v1002_v9 = vadd.f32 %v1807_v47, %v990_v8 }
 0x6ac   :  { %1168 = vmatprep.mubr.bf16.mxu0 %v2445_v0  ;;  %v2749_v10 = vadd.f32 %v1807_v47, %v989_v46 }
 0x6ad   :  { %1898 = vmatpush3.bf16.msra.mxu1 %v2135_v18 }
 0x6ae   :  { %v1006_v11 = vpack.c.bf16 %v1002_v9, %v2749_v10  ;;  %1899 = vmatprep.subr.bf16.mxu1 %v2136_v15 }
 0x6b3   :  { %1169 = vmatmul.mubr.bf16.gmra.mrb[32].mxu0 %v1005_v7 }
 0x6b4   :  { %1178 = vmatprep.mubr.bf16.mxu0 %v2445_v0  ;;  %v2137_v0 = vld [vmem:[#allocation11 + $0x18] sm:$0xff]  }
 0x6b5   :  { %1900 = vmatpush3.bf16.msra.mxu1 %v2137_v0 }
 0x6b6   :  { %1901 = vmatprep.subr.bf16.mxu1 %v2138_v16 }
 0x6b9   :  { %1902 = vmatpush3.bf16.msra.mxu1 %v2139_v17 }
 0x6ba   :  { %1903 = vmatprep.subr.bf16.mxu1 %v2140_v21 }
 0x6bb   :  { %1179 = vmatmul.mubr.bf16.gmra.mrb[36].mxu0 %v1006_v11 }
 0x6bd   :  { %1904 = vmatpush3.bf16.msra.mxu1 %v2141_v26 }
 0x6be   :  { %1905 = vmatprep.subr.bf16.mxu1 %v2142_v27 }
 0x6c1   :  { %1906 = vmatpush3.bf16.msra.mxu1 %v2143_v19 }
 0x6c2   :  { %1907 = vmatprep.subr.bf16.mxu1 %v2144_v28 }
 0x6c5   :  { %1908 = vmatpush3.bf16.msra.mxu1 %v2145_v29 }
 0x776   :  { %v1150_v20 = vpop.f32.mrb[24].mxu0 }
 0x777   :  { %v2764_v35 = vadd.f32 %v1150_v20, %v2757_v32  ;;  %v1152_v36 = vpop.f32.mrb[25].mxu0 }
 0x778   :  { %v2767_v37 = vadd.f32 %v1152_v36, %v2761_v34  ;;  %v1154_v39 = vpop.f32.mrb[26].mxu0 }
 0x779   :  { %v1189_v40 = vmul.f32 %v2764_v35, %v2764_v35  ;;  %v2772_v41 = vadd.f32 %v1154_v39, %v2757_v32  ;;  %v1156_v23 = vpop.f32.mrb[27].mxu0 }
 0x77a   :  { %v1190_v25 = vmul.f32 %v2767_v37, %v2767_v37  ;;  %v2777_v43 = vadd.f32 %v1156_v23, %v2761_v34 }
 0x77b   :  { %v1205_v44 = vmul.f32 %v1189_v40, %v2764_v35  ;;  %v1191_v45 = vmul.f32 %v2772_v41, %v2772_v41 }
 0x77c   :  { %v1206_v47 = vmul.f32 %v1190_v25, %v2767_v37  ;;  %v1192_v48 = vmul.f32 %v2777_v43, %v2777_v43 }
 0x77d   :  { %v1221_v49 = vmul.f32 0.044715, %v1205_v44  ;;  %v1207_v51 = vmul.f32 %v1191_v45, %v2772_v41 }
 0x77e   :  { %v1222_v53 = vmul.f32 0.044715, %v1206_v47  ;;  %v1208_v30 = vmul.f32 %v1192_v48, %v2777_v43  ;;  %v1160_v56 = vpop.f32.mrb[28].mxu0 }
 0x77f   :  { %v1237_v57 = vadd.f32 %v1221_v49, %v2764_v35  ;;  %v1223_v33 = vmul.f32 0.044715, %v1207_v51  ;;  %v2789_v59 = vadd.f32 %v1160_v56, %v2757_v32  ;;  %v1162_v60 = vpop.f32.mrb[29].mxu0 }
 0x780   :  { %v1238_v61 = vadd.f32 %v1222_v53, %v2767_v37  ;;  %v1224_v62 = vmul.f32 0.044715, %v1208_v30  ;;  %v2793_v63 = vadd.f32 %v1162_v60, %v2761_v34  ;;  %v1164_v38 = vpop.f32.mrb[30].mxu0 }
 0x781   :  { %v1253_v42 = vmul.f32 0.7978846, %v1237_v57  ;;  %v1239_v2 = vadd.f32 %v1223_v33, %v2772_v41  ;;  %v1193_v3 = vmul.f32 %v2789_v59, %v2789_v59  ;;  %v2799_v54 = vadd.f32 %v1164_v38, %v2757_v32  ;;  %v1166_v24 = vpop.f32.mrb[31].mxu0 }
 0x782   :  { %v1254_v4 = vmul.f32 0.7978846, %v1238_v61  ;;  %v1240_v5 = vadd.f32 %v1224_v62, %v2777_v43  ;;  %v1194_v50 = vmul.f32 %v2793_v63, %v2793_v63  ;;  %v2805_v7 = vadd.f32 %v1166_v24, %v2761_v34 }
 0x783   :  { %2206 = vtanh.f32 %v1253_v42  ;;  %v1255_v8 = vmul.f32 0.7978846, %v1239_v2  ;;  %v1209_v46 = vmul.f32 %v1193_v3, %v2789_v59  ;;  %v1195_v9 = vmul.f32 %v2799_v54, %v2799_v54 }
 0x784   :  { %2208 = vtanh.f32 %v1254_v4  ;;  %v1256_v11 = vmul.f32 0.7978846, %v1240_v5  ;;  %v1210_v12 = vmul.f32 %v1194_v50, %v2793_v63  ;;  %v1196_v13 = vmul.f32 %v2805_v7, %v2805_v7 }
 0x785   :  { %2210 = vtanh.f32 %v1255_v8  ;;  %v1225_v58 = vmul.f32 0.044715, %v1209_v46  ;;  %v1211_v14 = vmul.f32 %v1195_v9, %v2799_v54 }
 0x786   :  { %v1226_v55 = vmul.f32 0.044715, %v1210_v12  ;;  %v1212_v18 = vmul.f32 %v1196_v13, %v2805_v7  ;;  %v1170_v15 = vpop.f32.mrb[32].mxu0  ;;  %2212 = vtanh.f32 %v1256_v11 }
 0x787   :  { %v1241_v0 = vadd.f32 %v1225_v58, %v2789_v59  ;;  %v1227_v16 = vmul.f32 0.044715, %v1211_v14  ;;  %v2817_v17 = vadd.f32 %v1170_v15, %v2757_v32  ;;  %v1172_v21 = vpop.f32.mrb[33].mxu0 }
 0x788   :  { %v1242_v26 = vadd.f32 %v1226_v55, %v2793_v63  ;;  %v1228_v27 = vmul.f32 0.044715, %v1212_v18  ;;  %v2821_v19 = vadd.f32 %v1172_v21, %v2761_v34  ;;  %v1174_v28 = vpop.f32.mrb[34].mxu0 }
 0x789   :  { %v1257_v29 = vmul.f32 0.7978846, %v1241_v0  ;;  %v1243_v31 = vadd.f32 %v1227_v16, %v2799_v54  ;;  %v1197_v20 = vmul.f32 %v2817_v17, %v2817_v17  ;;  %v2827_v36 = vadd.f32 %v1174_v28, %v2757_v32  ;;  %v1176_v39 = vpop.f32.mrb[35].mxu0 }
 0x78a   :  { %v1258_v40 = vmul.f32 0.7978846, %v1242_v26  ;;  %v1244_v23 = vadd.f32 %v1228_v27, %v2805_v7  ;;  %v1198_v25 = vmul.f32 %v2821_v19, %v2821_v19  ;;  %v2833_v44 = vadd.f32 %v1176_v39, %v2761_v34 }
 0x78b   :  { %2214 = vtanh.f32 %v1257_v29  ;;  %v1259_v45 = vmul.f32 0.7978846, %v1243_v31  ;;  %v1213_v47 = vmul.f32 %v1197_v20, %v2817_v17  ;;  %v1199_v48 = vmul.f32 %v2827_v36, %v2827_v36 }
 0x78c   :  { %2216 = vtanh.f32 %v1258_v40  ;;  %v1260_v49 = vmul.f32 0.7978846, %v1244_v23  ;;  %v1214_v51 = vmul.f32 %v1198_v25, %v2821_v19  ;;  %v1200_v53 = vmul.f32 %v2833_v44, %v2833_v44 }
 0x78d   :  { %v2207_v30 = vpop.eup %2206  ;;  %2218 = vtanh.f32 %v1259_v45  ;;  %v1229_v56 = vmul.f32 0.044715, %v1213_v47  ;;  %v1215_v57 = vmul.f32 %v1199_v48, %v2827_v36 }
 0x78e   :  { %v2209_v33 = vpop.eup %2208  ;;  %v1285_v60 = vadd.f32 1.0, %v2207_v30  ;;  %2220 = vtanh.f32 %v1260_v49  ;;  %v1230_v61 = vmul.f32 0.044715, %v1214_v51  ;;  %v1216_v62 = vmul.f32 %v1200_v53, %v2833_v44  ;;  %v1180_v38 = vpop.f32.mrb[36].mxu0 }
 0x78f   :  { %v2211_v42 = vpop.eup %2210  ;;  %v1245_v2 = vadd.f32 %v1229_v56, %v2817_v17  ;;  %v1231_v3 = vmul.f32 0.044715, %v1215_v57  ;;  %v2845_v24 = vadd.f32 %v1180_v38, %v2757_v32  ;;  %v1182_v4 = vpop.f32.mrb[37].mxu0  ;;  %v1286_v5 = vadd.f32 1.0, %v2209_v33 }
 0x790   :  { %v1301_v50 = vmul.f32 0.5, %v1285_v60  ;;  %v1287_v8 = vadd.f32 1.0, %v2211_v42  ;;  %v1246_v46 = vadd.f32 %v1230_v61, %v2821_v19  ;;  %v1232_v9 = vmul.f32 0.044715, %v1216_v62  ;;  %v1184_v11 = vpop.f32.mrb[38].mxu0  ;;  %v2213_v18 = vpop.eup %2212 }
 0x791   :  { %v1261_v12 = vmul.f32 0.7978846, %v1245_v2  ;;  %v1247_v13 = vadd.f32 %v1231_v3, %v2827_v36  ;;  %v1201_v58 = vmul.f32 %v2845_v24, %v2845_v24  ;;  %v2852_v14 = vadd.f32 %v1182_v4, %v2761_v34  ;;  %v1186_v55 = vpop.f32.mrb[39].mxu0 }
 0x792   :  { %v1317_v15 = vmul.f32 %v1301_v50, %v2764_v35  ;;  %v1303_v0 = vmul.f32 0.5, %v1287_v8  ;;  %v1262_v16 = vmul.f32 0.7978846, %v1246_v46  ;;  %v1248_v21 = vadd.f32 %v1232_v9, %v2833_v44 }
 0x793   :  { %2222 = vtanh.f32 %v1261_v12  ;;  %v1263_v26 = vmul.f32 0.7978846, %v1247_v13  ;;  %v1217_v27 = vmul.f32 %v1201_v58, %v2845_v24  ;;  %v1202_v28 = vmul.f32 %v2852_v14, %v2852_v14 }
 0x794   :  { %v1319_v29 = vmul.f32 %v1303_v0, %v2772_v41  ;;  %2224 = vtanh.f32 %v1262_v16  ;;  %v1264_v31 = vmul.f32 0.7978846, %v1248_v21  ;;  %v2861_v20 = vadd.f32 %v1184_v11, %v2757_v32 }
 0x795   :  { %v2215_v39 = vpop.eup %2214  ;;  %2226 = vtanh.f32 %v1263_v26  ;;  %v1233_v35 = vmul.f32 0.044715, %v1217_v27  ;;  %v1218_v40 = vmul.f32 %v1202_v28, %v2852_v14  ;;  %v2865_v23 = vadd.f32 %v1186_v55, %v2761_v34 }
 0x796   :  { %v2217_v25 = vpop.eup %2216  ;;  %v1333_v45 = vpack.c.bf16 %v1319_v29, %v1317_v15  ;;  %2228 = vtanh.f32 %v1264_v31  ;;  %v1203_v47 = vmul.f32 %v2861_v20, %v2861_v20  ;;  %v1288_v41 = vadd.f32 1.0, %v2213_v18 }
 0x797   :  { %v2219_v48 = vpop.eup %2218  ;;  %v1249_v49 = vadd.f32 %v1233_v35, %v2845_v24  ;;  %v1234_v32 = vmul.f32 0.044715, %v1218_v40  ;;  %v1204_v51 = vmul.f32 %v2865_v23, %v2865_v23  ;;  %v1302_v53 = vmul.f32 0.5, %v1286_v5 }
 0x798   :  { %v2221_v30 = vpop.eup %2220  ;;  %v1219_v56 = vmul.f32 %v1203_v47, %v2861_v20  ;;  %v1304_v34 = vmul.f32 0.5, %v1288_v41  ;;  %v1290_v57 = vadd.f32 1.0, %v2217_v25  ;;  %v1289_v33 = vadd.f32 1.0, %v2215_v39 }
 0x799   :  { %v1265_v60 = vmul.f32 0.7978846, %v1249_v49  ;;  %v1250_v61 = vadd.f32 %v1234_v32, %v2852_v14  ;;  %v1220_v62 = vmul.f32 %v1204_v51, %v2865_v23  ;;  %v1318_v38 = vmul.f32 %v1302_v53, %v2767_v37 }
 0x79a   :  { %v1235_v42 = vmul.f32 0.044715, %v1219_v56  ;;  %v1320_v2 = vmul.f32 %v1304_v34, %v2777_v43  ;;  %v1292_v3 = vadd.f32 1.0, %v2221_v30  ;;  %v1306_v4 = vmul.f32 0.5, %v1290_v57 }
 0x79b   :  { %2230 = vtanh.f32 %v1265_v60  ;;  %v1266_v5 = vmul.f32 0.7978846, %v1250_v61  ;;  %v1236_v50 = vmul.f32 0.044715, %v1220_v62  ;;  %v1291_v8 = vadd.f32 1.0, %v2219_v48 }
 0x79c   :  { %v1251_v46 = vadd.f32 %v1235_v42, %v2861_v20  ;;  %v1334_v9 = vpack.c.bf16 %v1320_v2, %v1318_v38  ;;  %v1308_v11 = vmul.f32 0.5, %v1292_v3  ;;  %v1305_v58 = vmul.f32 0.5, %v1289_v33 }
 0x79d   :  { %v2223_v12 = vpop.eup %2222  ;;  %2232 = vtanh.f32 %v1266_v5  ;;  %v1252_v13 = vadd.f32 %v1236_v50, %v2865_v23  ;;  %v1307_v55 = vmul.f32 0.5, %v1291_v8  ;;  %v1322_v43 = vmul.f32 %v1306_v4, %v2793_v63 }
 0x79e   :  { %v2225_v37 = vpop.eup %2224  ;;  %v1267_v18 = vmul.f32 0.7978846, %v1251_v46  ;;  %1505 = vmatprep.mubr.bf16.mxu1 %v1334_v9  ;;  %v1324_v15 = vmul.f32 %v1308_v11, %v2805_v7  ;;  %v1293_v0 = vadd.f32 1.0, %v2223_v12  ;;  %v1321_v26 = vmul.f32 %v1305_v58, %v2789_v59 }
 0x79f   :  { %v2227_v16 = vpop.eup %2226  ;;  %v1268_v21 = vmul.f32 0.7978846, %v1252_v13  ;;  %1506 = vmatmul.mubr.bf16.vlgmr.msra.gmra.mrb[24].mxu1 %v1333_v45  ;;  %v1323_v27 = vmul.f32 %v1307_v55, %v2799_v54  ;;  %v1294_v28 = vadd.f32 1.0, %v2225_v37 }
 0x7a0   :  { %v2229_v29 = vpop.eup %2228  ;;  %2234 = vtanh.f32 %v1267_v18  ;;  %v1336_v31 = vpack.c.bf16 %v1324_v15, %v1322_v43  ;;  %v1295_v39 = vadd.f32 1.0, %v2227_v16  ;;  %v1309_v35 = vmul.f32 0.5, %v1293_v0 }
 0x7a1   :  { %2236 = vtanh.f32 %v1268_v21  ;;  %v1335_v40 = vpack.c.bf16 %v1323_v27, %v1321_v26  ;;  %v1296_v25 = vadd.f32 1.0, %v2229_v29  ;;  %v1310_v63 = vmul.f32 0.5, %v1294_v28 }
 0x7a2   :  { %1512 = vmatprep.mubr.bf16.mxu1 %v1336_v31  ;;  %v1311_v7 = vmul.f32 0.5, %v1295_v39  ;;  %v1325_v41 = vmul.f32 %v1309_v35, %v2817_v17 }
 0x7a3   :  { %v1312_v47 = vmul.f32 0.5, %v1296_v25  ;;  %v1326_v54 = vmul.f32 %v1310_v63, %v2821_v19 }
 0x7a4   :  { %v1327_v45 = vmul.f32 %v1311_v7, %v2827_v36 }
 0x7a5   :  { %v2231_v59 = vpop.eup %2230  ;;  %v1328_v48 = vmul.f32 %v1312_v47, %v2833_v44 }
 0x7a6   :  { %v1337_v49 = vpack.c.bf16 %v1327_v45, %v1325_v41  ;;  %v1297_v53 = vadd.f32 1.0, %v2231_v59 }
 0x7a7   :  { %v2233_v32 = vpop.eup %2232  ;;  %1513 = vmatmul.mubr.bf16.gmra.mrb[28].mxu1 %v1335_v40  ;;  %v1338_v51 = vpack.c.bf16 %v1328_v48, %v1326_v54 }
 0x7a8   :  { %v1298_v30 = vadd.f32 1.0, %v2233_v32  ;;  %v1313_v33 = vmul.f32 0.5, %v1297_v53  ;;  %v2146_v32 = vld [vmem:[#allocation13] sm:$0xff]   ;;  %v2147_v53 = vld [vmem:[#allocation13 + $0x8] sm:$0xff]  }
 0x7a9   :  { %1519 = vmatprep.mubr.bf16.mxu1 %v1338_v51  ;;  %v2446_v51 = vmov 0.0  }
 0x7aa   :  { %v2235_v56 = vpop.eup %2234  ;;  %v1314_v17 = vmul.f32 0.5, %v1298_v30  ;;  %v1329_v19 = vmul.f32 %v1313_v33, %v2845_v24  ;;  %v1825_v24 = vld [vmem:[%s2932_s7 + $0x3] ss:$0 sm:$0xff]  ;;  %2022 = vmatprep.subr.bf16.mxu0 %v2446_v51  ;;  %v2148_v30 = vld [vmem:[#allocation13 + $0x10] sm:$0xff]   ;;  %2038 = vmatprep.mubr.msk.bf16.mxu0 %vm2447_vm1, %v2446_v51 }
 0x7ab   :  { %v2237_v34 = vpop.eup %2236  ;;  %v1299_v57 = vadd.f32 1.0, %v2235_v56  ;;  %2023 = vmatpush3.bf16.msra.mxu0 %v2146_v32  ;;  %v2149_v56 = vld [vmem:[#allocation13 + $0x18] sm:$0xff]   ;;  %v2152_v33 = vld [vmem:[#allocation13 + $0x30] sm:$0xff]  }
 0x7ac   :  { %v1300_v60 = vadd.f32 1.0, %v2237_v34  ;;  %v1330_v62 = vmul.f32 %v1314_v17, %v2852_v14  ;;  %2024 = vmatprep.subr.bf16.mxu0 %v2446_v51  ;;  %v2150_v34 = vld [vmem:[#allocation13 + $0x20] sm:$0xff]  }
 0x7ad   :  { %v1315_v61 = vmul.f32 0.5, %v1299_v57  ;;  %v2151_v57 = vld [vmem:[#allocation13 + $0x28] sm:$0xff]  }
 0x7ae   :  { %v1316_v36 = vmul.f32 0.5, %v1300_v60  ;;  %v2153_v60 = vld [vmem:[#allocation13 + $0x38] sm:$0xff]  }
 0x7af   :  { %1520 = vmatmul.mubr.bf16.gmra.mrb[32].mxu1 %v1337_v49  ;;  %v1331_v44 = vmul.f32 %v1315_v61, %v2861_v20  ;;  %2025 = vmatpush3.bf16.msra.mxu0 %v2147_v53 }
 0x7b0   :  { %v1332_v38 = vmul.f32 %v1316_v36, %v2865_v23  ;;  %2026 = vmatprep.subr.bf16.mxu0 %v2446_v51 }
 0x7b1   :  { %v1339_v42 = vpack.c.bf16 %v1331_v44, %v1329_v19 }
 0x7b2   :  { %v1340_v2 = vpack.c.bf16 %v1332_v38, %v1330_v62 }
 0x7b3   :  { %2027 = vmatpush3.bf16.msra.mxu0 %v2148_v30 }
 0x7b4   :  { %1526 = vmatprep.mubr.bf16.mxu1 %v1340_v2  ;;  %2028 = vmatprep.subr.bf16.mxu0 %v2446_v51 }
 0x7b7   :  { %1527 = vmatmul.mubr.bf16.gmra.mrb[36].mxu1 %v1339_v42  ;;  %2029 = vmatpush3.bf16.msra.mxu0 %v2149_v56 }
 0x7b8   :  { %2030 = vmatprep.subr.bf16.mxu0 %v2446_v51 }
 0x7bb   :  { %2031 = vmatpush3.bf16.msra.mxu0 %v2150_v34 }
 0x7bc   :  { %2032 = vmatprep.subr.bf16.mxu0 %v2446_v51 }
 0x7bf   :  { %2033 = vmatpush3.bf16.msra.mxu0 %v2151_v57 }
 0x7c0   :  { %2034 = vmatprep.subr.bf16.mxu0 %v2446_v51 }
 0x7c3   :  { %2035 = vmatpush3.bf16.msra.mxu0 %v2152_v33 }
 0x7c4   :  { %2036 = vmatprep.subr.bf16.mxu0 %v2446_v51 }
 0x7c7   :  { %2037 = vmatpush3.bf16.msra.mxu0 %v2153_v60 }
 0x872   :  { %v1909_v3 = vpop.f32.mrb[24].mxu1 }
 0x873   :  { %v1910_v4 = vpop.f32.mrb[25].mxu1 }
 0x874   :  { %v1911_v5 = vadd.f32 %v1910_v4, %v1909_v3  ;;  %v1912_v50 = vpop.f32.mrb[26].mxu1 }
 0x875   :  { %v1913_v8 = vpop.f32.mrb[27].mxu1 }
 0x876   :  { %v1508_v23 = vadd.f32 %v1911_v5, %v1825_v24 }
 0x878   :  { %v1534_v43 = vadd.f32 %v1508_v23, %v2731_v52 }
 0x87a   :  { %v1915_v46 = vpop.f32.mrb[28].mxu1 }
 0x87b   :  { %v1916_v9 = vpop.f32.mrb[29].mxu1 }
 0x87c   :  { %v1917_v11 = vadd.f32 %v1916_v9, %v1915_v46  ;;  %v1918_v12 = vpop.f32.mrb[30].mxu1  ;;  %v1842_v9 = vld [vmem:[%s2932_s7 + $0x4] ss:$0 sm:$0xff] }
 0x87d   :  { %v1919_v14 = vpop.f32.mrb[31].mxu1 }
 0x87e   :  { %v1515_v20 = vadd.f32 %v1917_v11, %v1825_v24 }
 0x880   :  { %v1535_v13 = vadd.f32 %v1515_v20, %v2738_v1  ;;  %v1843_v20 = vld [vmem:[%s2932_s7 + $0x5] ss:$0 sm:$0xff] }
 0x882   :  { %1540 = vadd.xlane.f32.xlu0 %v1535_v13  ;;  %v1921_v58 = vpop.f32.mrb[32].mxu1 }
 0x883   :  { %v1922_v55 = vpop.f32.mrb[33].mxu1 }
 0x884   :  { %v1923_v37 = vadd.f32 %v1922_v55, %v1921_v58  ;;  %v1924_v18 = vpop.f32.mrb[34].mxu1 }
 0x885   :  { %v1925_v15 = vpop.f32.mrb[35].mxu1 }
 0x886   :  { %v1522_v0 = vadd.f32 %v1923_v37, %v1825_v24  ;;  %1538 = vadd.xlane.f32.xlu0 %v1534_v43 }
 0x888   :  { %v1536_v16 = vadd.f32 %v1522_v0, %v2744_v6 }
 0x88a   :  { %1542 = vadd.xlane.f32.xlu1 %v1536_v16  ;;  %v1927_v21 = vpop.f32.mrb[36].mxu1 }
 0x88b   :  { %v1928_v26 = vpop.f32.mrb[37].mxu1 }
 0x88c   :  { %v1929_v27 = vadd.f32 %v1928_v26, %v1927_v21  ;;  %v1930_v28 = vpop.f32.mrb[38].mxu1 }
 0x88d   :  { %v1931_v29 = vpop.f32.mrb[39].mxu1 }
 0x88e   :  { %v1529_v31 = vadd.f32 %v1929_v27, %v1825_v24 }
 0x890   :  { %v1537_v1 = vadd.f32 %v1529_v31, %v2749_v10 }
 0x892   :  { %1544 = vadd.xlane.f32.xlu1 %v1537_v1 }
 0x90f   :  { %v1541_v39 = vpop.xlane.xlu0 %1540 }
 0x910   :  { %v1547_v35 = vmul.f32 0.0078125, %v1541_v39 }
 0x912   :  { %v1551_v40 = vsub.f32 %v1535_v13, %v1547_v35 }
 0x913   :  { %v1539_v25 = vpop.xlane.xlu0 %1538 }
 0x914   :  { %v1546_v52 = vmul.f32 0.0078125, %v1539_v25  ;;  %v1555_v63 = vmul.f32 %v1551_v40, %v1551_v40 }
 0x916   :  { %v1550_v7 = vsub.f32 %v1534_v43, %v1546_v52  ;;  %1560 = vadd.xlane.f32.xlu0 %v1555_v63 }
 0x917   :  { %v1543_v47 = vpop.xlane.xlu1 %1542 }
 0x918   :  { %v1548_v6 = vmul.f32 0.0078125, %v1543_v47  ;;  %v1554_v41 = vmul.f32 %v1550_v7, %v1550_v7  ;;  %v2448_v47 = vmov 1983009808  }
 0x91a   :  { %v1552_v45 = vsub.f32 %v1536_v16, %v1548_v6  ;;  %1558 = vadd.xlane.f32.xlu0 %v1554_v41  ;;  %v1732_v6 = vunpack.c.l.s4 %v2448_v47 }
 0x91c   :  { %v1556_v59 = vmul.f32 %v1552_v45, %v1552_v45  ;;  %v1733_v41 = vunpack.c.0.s8 %v1732_v6 }
 0x91e   :  { %1562 = vadd.xlane.f32.xlu1 %v1556_v59  ;;  %v1736_v59 = vsub.s32 %v1733_v41, %v2621_v22 }
 0x91f   :  { %v1545_v54 = vpop.xlane.xlu1 %1544 }
 0x920   :  { %v1549_v48 = vmul.f32 0.0078125, %v1545_v54 }
 0x922   :  { %v2898_v49 = vsub.f32 %v1537_v1, %v1549_v48 }
 0x924   :  { %v1557_v10 = vmul.f32 %v2898_v49, %v2898_v49 }
 0x926   :  { %1564 = vadd.xlane.f32.xlu1 %v1557_v10 }
 0x9a3   :  { %v1561_v17 = vpop.xlane.xlu0 %1560 }
 0x9a4   :  { %v1567_v61 = vmul.f32 0.0078125, %v1561_v17 }
 0x9a6   :  { %v1571_v36 = vadd.f32 1e-12, %v1567_v61 }
 0x9a7   :  { %v1559_v19 = vpop.xlane.xlu0 %1558 }
 0x9a8   :  { %v1566_v44 = vmul.f32 0.0078125, %v1559_v19  ;;  %2238 = vrsqrt.f32 %v1571_v36 }
 0x9aa   :  { %v1570_v62 = vadd.f32 1e-12, %v1566_v44 }
 0x9ab   :  { %v1563_v38 = vpop.xlane.xlu1 %1562 }
 0x9ac   :  { %2240 = vrsqrt.f32 %v1570_v62  ;;  %v1568_v42 = vmul.f32 0.0078125, %v1563_v38 }
 0x9ae   :  { %v1572_v2 = vadd.f32 1e-12, %v1568_v42 }
 0x9b0   :  { %2242 = vrsqrt.f32 %v1572_v2 }
 0x9b2   :  { %v2239_v4 = vpop.eup %2238 }
 0x9b3   :  { %v1565_v3 = vpop.xlane.xlu1 %1564  ;;  %v1579_v46 = vmul.f32 %v2239_v4, %v1551_v40 }
 0x9b4   :  { %v1569_v5 = vmul.f32 0.0078125, %v1565_v3 }
 0x9b5   :  { %v1587_v24 = vmul.f32 %v1842_v9, %v1579_v46 }
 0x9b6   :  { %v2241_v50 = vpop.eup %2240  ;;  %v1573_v8 = vadd.f32 1e-12, %v1569_v5 }
 0x9b7   :  { %v1578_v11 = vmul.f32 %v2241_v50, %v1550_v7  ;;  %v1595_v58 = vadd.f32 %v1843_v20, %v1587_v24 }
 0x9b8   :  { %2244 = vrsqrt.f32 %v1573_v8 }
 0x9b9   :  { %v1586_v23 = vmul.f32 %v1842_v9, %v1578_v11  ;;  %v1599_v15 = vpack.c.bf16 %v1595_v58, %v1595_v58 }
 0x9ba   :  { %v2243_v12 = vpop.eup %2242 }
 0x9bb   :  { %v1580_v14 = vmul.f32 %v2243_v12, %v1552_v45  ;;  %v1594_v37 = vadd.f32 %v1843_v20, %v1586_v23  ;;  %v1628_v27 = vunpack.c.l.b16 %v1599_v15  ;;  %v1844_v45 = vld [vmem:[%s2933_s8 + $0x2] ss:$0 sm:$0xff] }
 0x9bd   :  { %v1588_v13 = vmul.f32 %v1842_v9, %v1580_v14  ;;  %v1598_v16 = vpack.c.bf16 %v1594_v37, %v1594_v37  ;;  %v1631_v39 = vrot.slane %v1628_v27, 7 }
 0x9bf   :  { %v1596_v55 = vadd.f32 %v1843_v20, %v1588_v13  ;;  %v1627_v29 = vunpack.c.l.b16 %v1598_v16 }
 0x9c1   :  { %v1600_v43 = vpack.c.bf16 %v1596_v55, %v1596_v55  ;;  %v1633_v40 = vsel %vm1632_vm2, %v1631_v39, %v1627_v29 }
 0x9c2   :  { %v2245_v18 = vpop.eup %2244 }
 0x9c3   :  { %v1581_v0 = vmul.f32 %v2245_v18, %v2898_v49  ;;  %v1629_v26 = vunpack.c.l.b16 %v1600_v43 }
 0x9c5   :  { %v1589_v21 = vmul.f32 %v1842_v9, %v1581_v0  ;;  %v1634_v1 = vrot.slane %v1629_v26, 6 }
 0x9c7   :  { %v1597_v28 = vadd.f32 %v1843_v20, %v1589_v21  ;;  %v1636_v52 = vsel %vm1635_vm3, %v1634_v1, %v1633_v40 }
 0x9c9   :  { %v1601_v31 = vpack.c.bf16 %v1597_v28, %v1597_v28 }
 0x9cb   :  { %v1630_v35 = vunpack.c.l.b16 %v1601_v31 }
 0x9cd   :  { %v1637_v25 = vrot.slane %v1630_v35, 5 }
 0x9cf   :  { %v1639_v63 = vsel %vm1638_vm4, %v1637_v25, %v1636_v52 }
 0x9d0   :  { %v1640_v7 = vpack.c.b16 %v1639_v63, %v1639_v63 }
 0x9d2   :  { %2039 = vmatmul.mubr.bf16.vlgmr.msra.gmra.mrb[40].mxu0 %v1640_v7 }
 0xaa5   :  { %v1724_v54 = vpop.f32.mrb[40].mxu0 }
 0xaa6   :  { %v1725_v48 = vadd.f32 %v1844_v45, %v1724_v54  ;;  %v2040_v49 = vpop.f32.mrb[41].mxu0 }
 0xaa7   :  { %v1727_v10 = vpop.f32.mrb[42].mxu0 }
 0xaa8   :  { %v1737_v32 = vrot.slane %v1725_v48, %v1736_v59  ;;  %v2041_v51 = vpop.f32.mrb[43].mxu0 }
 0xaaa   :  { %v1738_v53 = vcombine.high %v1737_v32, %v1737_v32  ;;  %v1741_v30 = vpack.c.bf16 %v1737_v32, %v1737_v32 }
 0xaac   :  { %v1742_v56 = vpack.c.bf16 %v1738_v53, %v1738_v53  ;;  %1743 = vst [vmem:[#allocation14] sm:$0x1] %v1741_v30 }
 0xaae   :  { %1744 = vst [vmem:[#allocation14 + $0x1] sm:$0x1] %v1742_v56 }
 0xaaf   :  { %2411 = shalt.err (!%p2408_p4)
}
 0xab0   :  { %s2412_s11 = scalar_lea.hbm %s2934_s9, 32 }
 0xab1   :  { %p2413_p5 = scmp.ne.s32.totalorder %s2934_s9, %s2412_s11  ;;  %p2416_p6 = scmp.lt.u32.totalorder %s2412_s11, %s2934_s9 }
 0xab3   :  { %p2418_p7 = pnand %p2416_p6, %p2413_p5 }
 0xab5   :  { %2421 = shalt.err (!%p2418_p7)
}
 0xab6   :  { %s2450_s4 = smov 16   ;;  %s2451_s19 = smov 1  }
 0xab7   :  { %1756 = dma.vmem_to_hbm [thread:$0]  %s1751_s3, 32, %s2934_s9, [#allocation4], %s2450_s4, %s2450_s4, %s2451_s19  }
 0xab8   :  { %2430 = dma.done.wait [#allocation4], 32  }
 0xab9   :  { %2431 = vsyncadd [#allocation4], 4294967264 }
 0xaba   :  { %1760 = vsyncpa [#allocation3], 1 }
 0xabb   :  { %1761 = vsyncpa [#allocation6], 1 }
 0xabc   :  { %1762 = vsyncpa [#allocation9], 1 }
 0xabd   :  { %1763 = vsyncpa [#allocation12], 1 }
 0xabe   :  { %1764 = vsyncpa [#allocation4], 1 }

</bundles_post_ra>
